<compile_context>
chip_gen: v6e
topology: v6e:2x2x1
jax: 0.10.0
libtpu: 0.0.40
codegen_flags: <defaults>
</compile_context>

<pallas_src>
import jax
import jax.numpy as jnp
from jax.experimental import pallas as pl
from jax.experimental.pallas import tpu as pltpu

FEAT_DIM = 768       # encoder.feature_dim (no-head branch of the module)
HIDDEN_DIM = 512     # projection hidden
PROJ_DIM = 128       # projection_dim default
NORM_EPS = 1e-12     # F.normalize default eps

MAX_TILE_B = 512     # batch tile cap (fits the v7x VMEM budget derived below)


def _cdiv(a, b):
    return -(-a // b)


def _round_up(x, m):
    return _cdiv(x, m) * m


def _vmem_capacity_bytes():
    """Physical VMEM per TensorCore; conservative fallback if query fails."""
    try:
        return int(pltpu.get_tpu_info().vmem_capacity_bytes)
    except Exception:
        return 64 * 2 ** 20          # v7x-sized fallback (safe everywhere)


def _split_dim(total, max_tile, align, min_tiles=1):
    """Balanced tiling: n tiles of size round_up(ceil(total/n), align)."""
    n = max(min_tiles, _cdiv(total, max_tile))
    tile = _round_up(_cdiv(total, n), align)
    n = _cdiv(total, tile)
    return n, tile, n * tile


def simclr_kernel(x_ref, wenc_ref, benc_ref, w1_ref, b1_ref, w2_ref, b2_ref,
                  h_ref, z_ref, acc_ref):
    """Grid = (batch_tiles, k_tiles); k (encoder reduction) is the inner axis."""
    k = pl.program_id(1)

    # --- init the f32 accumulator on the first K step ---
    @pl.when(k == 0)
    def _init():
        acc_ref[...] = jnp.zeros_like(acc_ref)

    # --- encoder partial matmul: acc += x_tile @ Wenc_tile ---
    # x arrives f32 (saves a wrapper HBM pass); cast to bf16 in-register right
    # before the MXU.  f32 accumulation.
    acc_ref[...] += jnp.dot(x_ref[...].astype(jnp.bfloat16), wenc_ref[...],
                            preferred_element_type=jnp.float32)

    # --- finalize on the last K step: bias, projection MLP, normalize ---
    @pl.when(k == pl.num_programs(1) - 1)
    def _finalize():
        h = acc_ref[...] + benc_ref[...]                      # f32 bias add (once)
        h_ref[...] = h.astype(h_ref.dtype)

        z1 = jnp.dot(h.astype(w1_ref.dtype), w1_ref[...],
                     preferred_element_type=jnp.float32) + b1_ref[...]
        z1 = jnp.maximum(z1, 0.0)                             # ReLU on VPU (f32)
        z2 = jnp.dot(z1.astype(w2_ref.dtype), w2_ref[...],
                     preferred_element_type=jnp.float32) + b2_ref[...]

        # F.normalize(z, dim=1): z / max(||z||, eps) == z * rsqrt(max(||z||^2, eps^2))
        sq = jnp.sum(z2 * z2, axis=1, keepdims=True)
        inv = jax.lax.rsqrt(jnp.maximum(sq, NORM_EPS * NORM_EPS))
        z_ref[...] = (z2 * inv).astype(z_ref.dtype)


def make_simclr_forward(params, in_features):
    """One-time parameter prep (pad + bf16 cast) and a jitted forward closure.

    Weights are padded/cast exactly once here (eagerly), not on every forward
    call; the returned closure only pads/reshapes x and launches the kernel.
    """
    wenc, benc, w1, b1, w2, b2 = params

    vmem_cap = _vmem_capacity_bytes()
    big_vmem = vmem_cap >= 96 * 2 ** 20            # v5e / v6e: 128 MiB; v7x: 64 MiB
    max_tile_k = 8192 if big_vmem else 4096
    vmem_limit_cap = (100 if big_vmem else 44) * 2 ** 20

    n_k, tile_k, k_pad = _split_dim(in_features, max_tile_k, 128)

    # ---- one-time weight prep (hoisted out of the per-call path) ----
    wenc_p = wenc
    if k_pad != in_features:
        wenc_p = jnp.pad(wenc, ((0, k_pad - in_features), (0, 0)))
    wenc_p = wenc_p.astype(jnp.bfloat16)
    w1_b = w1.astype(jnp.bfloat16)
    w2_b = w2.astype(jnp.bfloat16)
    benc_f = benc.astype(jnp.float32)
    b1_f = b1.astype(jnp.float32)
    b2_f = b2.astype(jnp.float32)

    def forward(x):
        B = x.shape[0]
        x_flat = x.reshape(B, -1)                  # same as torch.flatten(x, 1)
        K = x_flat.shape[1]
        assert K == in_features, (K, in_features)

        # >= 2 batch tiles once B is large enough so v7x's two TensorCores
        # both get work; negligible overhead on single-TC chips.
        min_tiles_b = 2 if B >= 256 else 1
        n_b, tile_b, b_pad = _split_dim(B, MAX_TILE_B, 16, min_tiles_b)

        x_p = x_flat
        if b_pad != B or k_pad != K:               # skip pad when already aligned
            x_p = jnp.pad(x_flat, ((0, b_pad - B), (0, k_pad - K)))

        out_shapes = (
            jax.ShapeDtypeStruct((b_pad, FEAT_DIM), jnp.float32),
            jax.ShapeDtypeStruct((b_pad, PROJ_DIM), jnp.float32),
        )

        # ---------------- cost hint ----------------
        flops = 2 * b_pad * (k_pad * FEAT_DIM + FEAT_DIM * HIDDEN_DIM
                             + HIDDEN_DIM * PROJ_DIM)
        bytes_accessed = (
            b_pad * k_pad * 4                          # x (f32), read once
            + n_b * k_pad * FEAT_DIM * 2               # wenc re-streamed per batch tile
            + FEAT_DIM * HIDDEN_DIM * 2                # w1 (resident, read once)
            + HIDDEN_DIM * PROJ_DIM * 2                # w2
            + (FEAT_DIM + HIDDEN_DIM + PROJ_DIM) * 4   # biases
            + b_pad * (FEAT_DIM + PROJ_DIM) * 4)       # h + z outputs
        cost = pl.CostEstimate(flops=flops, transcendentals=b_pad,
                               bytes_accessed=bytes_accessed)

        # ---------------- honest VMEM accounting ----------------
        vmem_needed = (
            2 * tile_b * tile_k * 4                     # x tiles (f32, double-buffered)
            + 2 * tile_k * FEAT_DIM * 2                 # wenc tiles (bf16, double-buffered)
            + 2 * FEAT_DIM * HIDDEN_DIM * 2             # w1 (bf16, pipeline buffers)
            + 2 * HIDDEN_DIM * PROJ_DIM * 2             # w2
            + 2 * (FEAT_DIM + HIDDEN_DIM + PROJ_DIM) * 4  # biases
            + tile_b * FEAT_DIM * 4                     # f32 accumulator scratch
            + 2 * tile_b * FEAT_DIM * 4                 # h output buffers
            + 2 * tile_b * PROJ_DIM * 4                 # z output buffers
            + tile_b * (FEAT_DIM + HIDDEN_DIM) * 4      # finalize f32 temps (h, z1)
            + tile_b * (FEAT_DIM + HIDDEN_DIM) * 2)     # bf16 casts of h, z1 for MXU
        vmem_limit = int(min(max(int(vmem_needed * 1.25), 16 * 2 ** 20),
                             vmem_limit_cap))

        h, z = pl.pallas_call(
            simclr_kernel,
            out_shape=out_shapes,
            grid_spec=pltpu.PrefetchScalarGridSpec(
                num_scalar_prefetch=0,
                grid=(n_b, n_k),
                in_specs=[
                    pl.BlockSpec((tile_b, tile_k), lambda i, k: (i, k)),       # x tile (f32)
                    pl.BlockSpec((tile_k, FEAT_DIM), lambda i, k: (k, 0)),     # wenc tile
                    pl.BlockSpec((1, FEAT_DIM), lambda i, k: (0, 0)),          # benc
                    pl.BlockSpec((FEAT_DIM, HIDDEN_DIM), lambda i, k: (0, 0)),  # w1
                    pl.BlockSpec((1, HIDDEN_DIM), lambda i, k: (0, 0)),        # b1
                    pl.BlockSpec((HIDDEN_DIM, PROJ_DIM), lambda i, k: (0, 0)),  # w2
                    pl.BlockSpec((1, PROJ_DIM), lambda i, k: (0, 0)),          # b2
                ],
                out_specs=(
                    pl.BlockSpec((tile_b, FEAT_DIM), lambda i, k: (i, 0)),     # h
                    pl.BlockSpec((tile_b, PROJ_DIM), lambda i, k: (i, 0)),     # z
                ),
                scratch_shapes=[pltpu.VMEM((tile_b, FEAT_DIM), jnp.float32)],
            ),
            compiler_params=pltpu.CompilerParams(
                dimension_semantics=("parallel", "arbitrary"),
                vmem_limit_bytes=vmem_limit,
            ),
            cost_estimate=cost,
        )(x_p, wenc_p, benc_f, w1_b, b1_f, w2_b, b2_f)

        return h[:B], z[:B]

    return jax.jit(forward)


def init_params(key, in_features):
    """Deterministic synthetic weights (shapes from the module's __init__)."""
    ks = jax.random.split(key, 6)
    wenc = jax.random.normal(ks[0], (in_features, FEAT_DIM), jnp.float32) * 0.02
    benc = jax.random.normal(ks[1], (1, FEAT_DIM), jnp.float32) * 0.02
    w1 = jax.random.normal(ks[2], (FEAT_DIM, HIDDEN_DIM), jnp.float32) * 0.02
    b1 = jax.random.normal(ks[3], (1, HIDDEN_DIM), jnp.float32) * 0.02
    w2 = jax.random.normal(ks[4], (HIDDEN_DIM, PROJ_DIM), jnp.float32) * 0.02
    b2 = jax.random.normal(ks[5], (1, PROJ_DIM), jnp.float32) * 0.02
    return wenc, benc, w1, b1, w2, b2


if __name__ == "__main__":
    key = jax.random.PRNGKey(0)
    k_x, k_p = jax.random.split(key)

    B, C, H, W = 2, 4, 16, 16
    x = jax.random.normal(k_x, (B, C, H, W), jnp.float32)
    params = init_params(k_p, C * H * W)

    forward = make_simclr_forward(params, C * H * W)
    h, z = forward(x)
    jax.block_until_ready((h, z))

    # Reference in plain JAX mirroring the kernel's bf16-operand / f32-accumulate
    # path (the bf16 cast is the intended MXU dtype; f32 torch parity would need
    # looser tolerances).
    x_flat = x.reshape(B, -1)
    wenc, benc, w1, b1, w2, b2 = params
    bf = jnp.bfloat16
    h_ref = jnp.dot(x_flat.astype(bf), wenc.astype(bf),
                    preferred_element_type=jnp.float32) + benc
    z1_ref = jnp.maximum(
        jnp.dot(h_ref.astype(bf), w1.astype(bf),
                preferred_element_type=jnp.float32) + b1, 0.0)
    z2_ref = jnp.dot(z1_ref.astype(bf), w2.astype(bf),
                     preferred_element_type=jnp.float32) + b2
    z_ref = z2_ref / jnp.maximum(
        jnp.sqrt(jnp.sum(z2_ref * z2_ref, axis=1, keepdims=True)), NORM_EPS)

    assert h.shape == (B, FEAT_DIM) and z.shape == (B, PROJ_DIM)
    assert jnp.allclose(h, h_ref, atol=1e-2, rtol=1e-2)
    assert jnp.allclose(z, z_ref, atol=1e-2, rtol=1e-2)
    assert jnp.allclose(jnp.sum(z * z, axis=1), 1.0, atol=1e-3)

    print("KERNEL_OK")
</pallas_src>

<mosaic_0001>
module attributes {stable_mosaic.version = 11 : i64} {
  func.func @simclr_kernel(%arg0: i32, %arg1: i32, %arg2: memref<16x1024xf32, #tpu.memory_space<vmem>>, %arg3: memref<1024x768xbf16, #tpu.memory_space<vmem>>, %arg4: memref<1x768xf32, #tpu.memory_space<vmem>>, %arg5: memref<768x512xbf16, #tpu.memory_space<vmem>>, %arg6: memref<1x512xf32, #tpu.memory_space<vmem>>, %arg7: memref<512x128xbf16, #tpu.memory_space<vmem>>, %arg8: memref<1x128xf32, #tpu.memory_space<vmem>>, %arg9: memref<16x768xf32, #tpu.memory_space<vmem>>, %arg10: memref<16x128xf32, #tpu.memory_space<vmem>>, %arg11: memref<16x768xf32, #tpu.memory_space<vmem>>) attributes {dimension_semantics = [#tpu.dimension_semantics<parallel>, #tpu.dimension_semantics<arbitrary>], iteration_bounds = array<i64: 1, 1>, scalar_prefetch = 0 : i64, scratch_operands = 1 : i64, tpu.core_type = #tpu.core_type<tc>, window_params = [{transform_indices = @transform_0, window_bounds = array<i64: 16, 1024>}, {transform_indices = @transform_1, window_bounds = array<i64: 1024, 768>}, {pipeline_mode = #tpu.pipeline_mode<synchronous>, transform_indices = @transform_2, window_bounds = array<i64: 1, 768>}, {pipeline_mode = #tpu.pipeline_mode<synchronous>, transform_indices = @transform_3, window_bounds = array<i64: 768, 512>}, {pipeline_mode = #tpu.pipeline_mode<synchronous>, transform_indices = @transform_4, window_bounds = array<i64: 1, 512>}, {pipeline_mode = #tpu.pipeline_mode<synchronous>, transform_indices = @transform_5, window_bounds = array<i64: 512, 128>}, {pipeline_mode = #tpu.pipeline_mode<synchronous>, transform_indices = @transform_6, window_bounds = array<i64: 1, 128>}, {transform_indices = @transform_7, window_bounds = array<i64: 16, 768>}, {transform_indices = @transform_8, window_bounds = array<i64: 16, 128>}]} {
    %c0_i32 = arith.constant 0 : i32
    %0 = arith.cmpi eq, %arg1, %c0_i32 : i32
    %1 = arith.extui %0 : i1 to i32
    %c0_i32_0 = arith.constant 0 : i32
    %2 = arith.cmpi ne, %1, %c0_i32_0 : i32
    scf.if %2 {
      %cst_10 = arith.constant 0.000000e+00 : f32
      %13 = vector.broadcast %cst_10 : f32 to vector<16x768xf32>
      %c0_11 = arith.constant 0 : index
      %c0_12 = arith.constant 0 : index
      %14 = vector.load %arg11[%c0_11, %c0_12] : memref<16x768xf32, #tpu.memory_space<vmem>>, vector<16x768xf32>
      tpu.vector_store %arg11[%c0_11, %c0_12], %13 {strides = array<i32>} : memref<16x768xf32, #tpu.memory_space<vmem>>, vector<16x768xf32>,
    } else {
    }
    %c0 = arith.constant 0 : index
    %c0_1 = arith.constant 0 : index
    %3 = vector.load %arg11[%c0, %c0_1] : memref<16x768xf32, #tpu.memory_space<vmem>>, vector<16x768xf32>
    %c0_2 = arith.constant 0 : index
    %c0_3 = arith.constant 0 : index
    %4 = vector.load %arg2[%c0_2, %c0_3] : memref<16x1024xf32, #tpu.memory_space<vmem>>, vector<16x1024xf32>
    %5 = arith.truncf %4 : vector<16x1024xf32> to vector<16x1024xbf16>
    %c0_4 = arith.constant 0 : index
    %c0_5 = arith.constant 0 : index
    %6 = vector.load %arg3[%c0_4, %c0_5] : memref<1024x768xbf16, #tpu.memory_space<vmem>>, vector<1024x768xbf16>
    %cst = arith.constant dense<0.000000e+00> : vector<16x768xf32>
    %7 = tpu.matmul %5, %6, %cst {dimension_numbers = #tpu.dot_dimension_numbers<[1], [0], [0], [1], [0, 0, 1, 1], [], []>} : vector<16x1024xbf16>, vector<1024x768xbf16>, vector<16x768xf32> -> vector<16x768xf32>
    %8 = arith.addf %3, %7 : vector<16x768xf32>
    %c0_6 = arith.constant 0 : index
    %c0_7 = arith.constant 0 : index
    %9 = vector.load %arg11[%c0_6, %c0_7] : memref<16x768xf32, #tpu.memory_space<vmem>>, vector<16x768xf32>
    tpu.vector_store %arg11[%c0_6, %c0_7], %8 {strides = array<i32>} : memref<16x768xf32, #tpu.memory_space<vmem>>, vector<16x768xf32>,
    %c0_i32_8 = arith.constant 0 : i32
    %10 = arith.cmpi eq, %arg1, %c0_i32_8 : i32
    %11 = arith.extui %10 : i1 to i32
    %c0_i32_9 = arith.constant 0 : i32
    %12 = arith.cmpi ne, %11, %c0_i32_9 : i32
    scf.if %12 {
      %c0_10 = arith.constant 0 : index
      %c0_11 = arith.constant 0 : index
      %13 = vector.load %arg11[%c0_10, %c0_11] : memref<16x768xf32, #tpu.memory_space<vmem>>, vector<16x768xf32>
      %c0_12 = arith.constant 0 : index
      %c0_13 = arith.constant 0 : index
      %14 = vector.load %arg4[%c0_12, %c0_13] : memref<1x768xf32, #tpu.memory_space<vmem>>, vector<1x768xf32>
      %15 = vector.broadcast %14 : vector<1x768xf32> to vector<16x768xf32>
      %16 = arith.addf %13, %15 : vector<16x768xf32>
      %c0_14 = arith.constant 0 : index
      %c0_15 = arith.constant 0 : index
      %17 = vector.load %arg9[%c0_14, %c0_15] : memref<16x768xf32, #tpu.memory_space<vmem>>, vector<16x768xf32>
      tpu.vector_store %arg9[%c0_14, %c0_15], %16 {strides = array<i32>} : memref<16x768xf32, #tpu.memory_space<vmem>>, vector<16x768xf32>,
      %18 = arith.truncf %16 : vector<16x768xf32> to vector<16x768xbf16>
      %c0_16 = arith.constant 0 : index
      %c0_17 = arith.constant 0 : index
      %19 = vector.load %arg5[%c0_16, %c0_17] : memref<768x512xbf16, #tpu.memory_space<vmem>>, vector<768x512xbf16>
      %cst_18 = arith.constant dense<0.000000e+00> : vector<16x512xf32>
      %20 = tpu.matmul %18, %19, %cst_18 {dimension_numbers = #tpu.dot_dimension_numbers<[1], [0], [0], [1], [0, 0, 1, 1], [], []>} : vector<16x768xbf16>, vector<768x512xbf16>, vector<16x512xf32> -> vector<16x512xf32>
      %c0_19 = arith.constant 0 : index
      %c0_20 = arith.constant 0 : index
      %21 = vector.load %arg6[%c0_19, %c0_20] : memref<1x512xf32, #tpu.memory_space<vmem>>, vector<1x512xf32>
      %22 = vector.broadcast %21 : vector<1x512xf32> to vector<16x512xf32>
      %23 = arith.addf %20, %22 : vector<16x512xf32>
      %cst_21 = arith.constant 0.000000e+00 : f32
      %24 = vector.broadcast %cst_21 : f32 to vector<16x512xf32>
      %25 = arith.maximumf %23, %24 : vector<16x512xf32>
      %26 = arith.truncf %25 : vector<16x512xf32> to vector<16x512xbf16>
      %c0_22 = arith.constant 0 : index
      %c0_23 = arith.constant 0 : index
      %27 = vector.load %arg7[%c0_22, %c0_23] : memref<512x128xbf16, #tpu.memory_space<vmem>>, vector<512x128xbf16>
      %cst_24 = arith.constant dense<0.000000e+00> : vector<16x128xf32>
      %28 = tpu.matmul %26, %27, %cst_24 {dimension_numbers = #tpu.dot_dimension_numbers<[1], [0], [0], [1], [0, 0, 1, 1], [], []>} : vector<16x512xbf16>, vector<512x128xbf16>, vector<16x128xf32> -> vector<16x128xf32>
      %c0_25 = arith.constant 0 : index
      %c0_26 = arith.constant 0 : index
      %29 = vector.load %arg8[%c0_25, %c0_26] : memref<1x128xf32, #tpu.memory_space<vmem>>, vector<1x128xf32>
      %30 = vector.broadcast %29 : vector<1x128xf32> to vector<16x128xf32>
      %31 = arith.addf %28, %30 : vector<16x128xf32>
      %32 = arith.mulf %31, %31 : vector<16x128xf32>
      %cst_27 = arith.constant dense<0.000000e+00> : vector<16xf32>
      %33 = vector.multi_reduction <add>, %32, %cst_27 [1] : vector<16x128xf32> to vector<16xf32>
      %34 = vector.shape_cast %33 : vector<16xf32> to vector<16x1xf32>
      %cst_28 = arith.constant 1.000000e-24 : f32
      %35 = vector.broadcast %cst_28 : f32 to vector<16x1xf32>
      %36 = arith.maximumf %34, %35 : vector<16x1xf32>
      %37 = math.rsqrt %36 : vector<16x1xf32>
      %38 = vector.broadcast %37 : vector<16x1xf32> to vector<16x128xf32>
      %39 = arith.mulf %31, %38 : vector<16x128xf32>
      %c0_29 = arith.constant 0 : index
      %c0_30 = arith.constant 0 : index
      %40 = vector.load %arg10[%c0_29, %c0_30] : memref<16x128xf32, #tpu.memory_space<vmem>>, vector<16x128xf32>
      tpu.vector_store %arg10[%c0_29, %c0_30], %39 {strides = array<i32>} : memref<16x128xf32, #tpu.memory_space<vmem>>, vector<16x128xf32>,
    } else {
    }
    return
  }
  func.func @transform_0(%arg0: i32, %arg1: i32) -> (i32, i32) {
    %c0_i32 = arith.constant 0 : i32
    return %arg0, %arg1 : i32, i32
  }
  func.func @transform_1(%arg0: i32, %arg1: i32) -> (i32, i32) {
    %c0_i32 = arith.constant 0 : i32
    %c0_i32_0 = arith.constant 0 : i32
    return %arg1, %c0_i32 : i32, i32
  }
  func.func @transform_2(%arg0: i32, %arg1: i32) -> (i32, i32) {
    %c0_i32 = arith.constant 0 : i32
    %c0_i32_0 = arith.constant 0 : i32
    %c0_i32_1 = arith.constant 0 : i32
    return %c0_i32, %c0_i32_0 : i32, i32
  }
  func.func @transform_3(%arg0: i32, %arg1: i32) -> (i32, i32) {
    %c0_i32 = arith.constant 0 : i32
    %c0_i32_0 = arith.constant 0 : i32
    %c0_i32_1 = arith.constant 0 : i32
    return %c0_i32, %c0_i32_0 : i32, i32
  }
  func.func @transform_4(%arg0: i32, %arg1: i32) -> (i32, i32) {
    %c0_i32 = arith.constant 0 : i32
    %c0_i32_0 = arith.constant 0 : i32
    %c0_i32_1 = arith.constant 0 : i32
    return %c0_i32, %c0_i32_0 : i32, i32
  }
  func.func @transform_5(%arg0: i32, %arg1: i32) -> (i32, i32) {
    %c0_i32 = arith.constant 0 : i32
    %c0_i32_0 = arith.constant 0 : i32
    %c0_i32_1 = arith.constant 0 : i32
    return %c0_i32, %c0_i32_0 : i32, i32
  }
  func.func @transform_6(%arg0: i32, %arg1: i32) -> (i32, i32) {
    %c0_i32 = arith.constant 0 : i32
    %c0_i32_0 = arith.constant 0 : i32
    %c0_i32_1 = arith.constant 0 : i32
    return %c0_i32, %c0_i32_0 : i32, i32
  }
  func.func @transform_7(%arg0: i32, %arg1: i32) -> (i32, i32) {
    %c0_i32 = arith.constant 0 : i32
    %c0_i32_0 = arith.constant 0 : i32
    return %arg0, %c0_i32 : i32, i32
  }
  func.func @transform_8(%arg0: i32, %arg1: i32) -> (i32, i32) {
    %c0_i32 = arith.constant 0 : i32
    %c0_i32_0 = arith.constant 0 : i32
    return %arg0, %c0_i32 : i32, i32
  }
}

</mosaic_0001>

<bundles_post_ra>
// kernel: forward.1
= control target key start
LH: loop header
LB: loop body
LE: loop exit
PB: predicated region body
PF: predicated region fallthrough
CT: control target
= control target key end

     0   :  { %14 = vsyncpa [#allocation4], 0  ;;  %s6846_s0 = inlined_call_operand.vmem [shape: f32[16,1024], index: 0, kind: input, shape index: {}]   ;;  %s6847_s1 = inlined_call_operand.hbm [shape: bf16[1024,768], index: 1, kind: input, shape index: {}]   ;;  %s6848_s2 = inlined_call_operand.hbm [shape: f32[1,768], index: 2, kind: input, shape index: {}]   ;;  %s6849_s3 = inlined_call_operand.hbm [shape: bf16[768,512], index: 3, kind: input, shape index: {}]   ;;  %s6850_s4 = inlined_call_operand.hbm [shape: f32[1,512], index: 4, kind: input, shape index: {}]   ;;  %s6851_s5 = inlined_call_operand.hbm [shape: bf16[512,128], index: 5, kind: input, shape index: {}]   ;;  %s6852_s6 = inlined_call_operand.hbm [shape: f32[1,128], index: 6, kind: input, shape index: {}]   ;;  %s6853_s7 = inlined_call_operand.vmem [shape: f32[16,768], index: 7, kind: output, shape index: {0}]   ;;  %s6854_s8 = inlined_call_operand.vmem [shape: f32[16,128], index: 8, kind: output, shape index: {1}]  }
   0x1   :  { %15 = vsyncpa [#allocation6], 0 }
   0x2   :  { %16 = vsyncpa [#allocation9], 0 }
   0x3   :  { %17 = vsyncpa [#allocation12], 0  ;;  %s6587_s27 = smov [#allocation5]   ;;  %s6588_s29 = smov [#allocation8]  }
   0x4   :  { %s38_s28 = sshll.u32 %s6587_s27, 4  ;;  %s60_s30 = sshll.u32 %s6588_s29, 4  ;;  %s39_s28 = int_to_ptr.vmem [resolvable:$true] %s38_s28  ;;  %s61_s30 = int_to_ptr.vmem [resolvable:$true] %s60_s30 }
   0x5   :  { %s6467_s9 = scalar_lea.vmem %s39_s28, 96  ;;  %p6472_p1 = scmp.lt.s32.totalorder %s39_s28, %s39_s28 }
   0x6   :  { %p6468_p0 = scmp.ne.s32.totalorder %s39_s28, %s6467_s9  ;;  %p6473_p2 = scmp.lt.s32.totalorder %s6467_s9, %s6467_s9 }
   0x8   :  { %p6474_p3 = por %p6473_p2, %p6472_p1 }
   0xa   :  { %p6475_p4 = pnand %p6474_p3, %p6468_p0 }
   0xc   :  { %6478 = shalt.err (!%p6475_p4)
}
   0xd   :  { %41 = dma.hbm_to_vmem [thread:$0]  %s6848_s2, 96, %s39_s28, [#allocation6]  }
   0xe   :  { %s6487_s12 = scalar_lea.vmem %s61_s30, 64  ;;  %p6492_p6 = scmp.lt.s32.totalorder %s61_s30, %s61_s30 }
   0xf   :  { %p6488_p5 = scmp.ne.s32.totalorder %s61_s30, %s6487_s12  ;;  %p6493_p7 = scmp.lt.s32.totalorder %s6487_s12, %s6487_s12 }
  0x11   :  { %p6494_p8 = por %p6493_p7, %p6492_p6 }
  0x13   :  { %p6495_p9 = pnand %p6494_p8, %p6488_p5 }
  0x15   :  { %6498 = shalt.err (!%p6495_p9)
}
  0x16   :  { %63 = dma.hbm_to_vmem [thread:$0]  %s6850_s4, 64, %s61_s30, [#allocation9]  }
  0x17   :  { %s6589_s15 = smov [#allocation3]  }
  0x18   :  { %s25_s16 = sshll.u32 %s6589_s15, 4  ;;  %s26_s16 = int_to_ptr.vmem [resolvable:$true] %s25_s16 }
  0x19   :  { %s6507_s17 = scalar_lea.vmem %s26_s16, 49152  ;;  %p6512_p11 = scmp.lt.s32.totalorder %s26_s16, %s26_s16 }
  0x1a   :  { %p6508_p10 = scmp.ne.s32.totalorder %s26_s16, %s6507_s17  ;;  %p6513_p12 = scmp.lt.s32.totalorder %s6507_s17, %s6507_s17 }
  0x1c   :  { %p6514_p13 = por %p6513_p12, %p6512_p11 }
  0x1e   :  { %p6515_p0 = pnand %p6514_p13, %p6508_p10 }
  0x20   :  { %6518 = shalt.err (!%p6515_p0)
}
  0x21   :  { %s6590_s2 = smov 384   ;;  %s6591_s18 = smov 24  }
  0x22   :  { %31 = dma.hbm_to_vmem [thread:$0]  %s6847_s1, 49152, %s26_s16, [#allocation4], %s6590_s2, %s6590_s2, %s6591_s18  }
  0x23   :  { %s6592_s21 = smov [#allocation7]  }
  0x24   :  { %s47_s22 = sshll.u32 %s6592_s21, 4  ;;  %s48_s22 = int_to_ptr.vmem [resolvable:$true] %s47_s22 }
  0x25   :  { %s6527_s4 = scalar_lea.vmem %s48_s22, 24576  ;;  %p6532_p2 = scmp.lt.s32.totalorder %s48_s22, %s48_s22 }
  0x26   :  { %p6528_p1 = scmp.ne.s32.totalorder %s48_s22, %s6527_s4  ;;  %p6533_p3 = scmp.lt.s32.totalorder %s6527_s4, %s6527_s4 }
  0x28   :  { %p6534_p4 = por %p6533_p3, %p6532_p2 }
  0x2a   :  { %p6535_p5 = pnand %p6534_p4, %p6528_p1 }
  0x2c   :  { %6538 = shalt.err (!%p6535_p5)
}
  0x2d   :  { %s6593_s23 = smov 256   ;;  %s6594_s24 = smov 16  }
  0x2e   :  { %53 = dma.hbm_to_vmem [thread:$0]  %s6849_s3, 24576, %s48_s22, [#allocation6], %s6593_s23, %s6593_s23, %s6594_s24  }
  0x2f   :  { %s6595_s27 = smov [#allocation10]  }
  0x30   :  { %s69_s28 = sshll.u32 %s6595_s27, 4  ;;  %s70_s28 = int_to_ptr.vmem [resolvable:$true] %s69_s28 }
  0x31   :  { %s6547_s1 = scalar_lea.vmem %s70_s28, 4096  ;;  %p6552_p7 = scmp.lt.s32.totalorder %s70_s28, %s70_s28 }
  0x32   :  { %p6548_p6 = scmp.ne.s32.totalorder %s70_s28, %s6547_s1  ;;  %p6553_p8 = scmp.lt.s32.totalorder %s6547_s1, %s6547_s1 }
  0x34   :  { %p6554_p9 = por %p6553_p8, %p6552_p7 }
  0x36   :  { %p6555_p10 = pnand %p6554_p9, %p6548_p6 }
  0x38   :  { %6558 = shalt.err (!%p6555_p10)
}
  0x39   :  { %s6596_s29 = smov 64   ;;  %s6597_s30 = smov 4  }
  0x3a   :  { %75 = dma.hbm_to_vmem [thread:$0]  %s6851_s5, 4096, %s70_s28, [#allocation9], %s6596_s29, %s6596_s29, %s6597_s30  }
  0x3b   :  { %s6598_s11 = smov [#allocation11]  }
  0x3c   :  { %s82_s12 = sshll.u32 %s6598_s11, 4  ;;  %s83_s12 = int_to_ptr.vmem [resolvable:$true] %s82_s12 }
  0x3d   :  { %s6567_s3 = scalar_lea.vmem %s83_s12, 16  ;;  %s6571_s13 = scalar_lea.vmem %s83_s12, 32 }
  0x3e   :  { %p6568_p11 = scmp.ne.s32.totalorder %s83_s12, %s6567_s3  ;;  %p6572_p12 = scmp.lt.s32.totalorder %s83_s12, %s83_s12 }
  0x3f   :  { %p6573_p13 = scmp.lt.s32.totalorder %s6571_s13, %s6567_s3 }
  0x41   :  { %p6574_p0 = por %p6573_p13, %p6572_p12 }
  0x43   :  { %p6575_p1 = pnand %p6574_p0, %p6568_p11 }
  0x45   :  { %6578 = shalt.err (!%p6575_p1)
}
  0x46   :  { %85 = dma.hbm_to_vmem [thread:$0]  %s6852_s6, 16, %s83_s12, [#allocation12]  }
  0x47   :  { %6579 = dma.done.wait [#allocation4], 49152  }
  0x48   :  { %6580 = vsyncadd [#allocation4], 4294918144 }
  0x49   :  { %6581 = dma.done.wait [#allocation6], 24672  }
  0x4a   :  { %6582 = vsyncadd [#allocation6], 4294942624 }
  0x4b   :  { %6583 = dma.done.wait [#allocation9], 4160  }
  0x4c   :  { %6584 = vsyncadd [#allocation9], 4294963136 }
  0x4d   :  { %6585 = dma.done.wait [#allocation12], 16  }
  0x4e   :  { %6586 = vsyncadd [#allocation12], 4294967280  ;;  %v5558_v0 = vld [vmem:[#allocation3 + $0x154] ss:$24 sps:$4 sm:$0xff]   ;;  %v5562_v2 = vld [vmem:[#allocation3 + $0x150] ss:$24 sps:$4 sm:$0xff]  }
  0x4f   :  { %v5560_v1 = vld [vmem:[#allocation3 + $0x454] ss:$24 sps:$4 sm:$0xff]   ;;  %2461 = vmatprep.subr.bf16.mxu0 %v5558_v0  ;;  %v5563_v3 = vld [vmem:[#allocation3 + $0x450] ss:$24 sps:$4 sm:$0xff]   ;;  %v5564_v4 = vld [vmem:[#allocation3 + $0x124] ss:$24 sps:$4 sm:$0xff]  }
  0x50   :  { %2504 = vmatprep.subr.bf16.mxu1 %v5560_v1  ;;  %2462 = vmatpush1.bf16.msra.mxu0 %v5562_v2  ;;  %v5566_v5 = vld [vmem:[#allocation3 + $0x424] ss:$24 sps:$4 sm:$0xff]   ;;  %v5568_v6 = vld [vmem:[#allocation3 + $0x120] ss:$24 sps:$4 sm:$0xff]   ;;  %v5570_v8 = vld [vmem:[#allocation3 + $0xf4] ss:$24 sps:$4 sm:$0xff]  }
  0x51   :  { %2505 = vmatpush1.bf16.msra.mxu1 %v5563_v3  ;;  %2463 = vmatprep.subr.bf16.mxu0 %v5564_v4  ;;  %v5569_v7 = vld [vmem:[#allocation3 + $0x420] ss:$24 sps:$4 sm:$0xff]   ;;  %v5572_v9 = vld [vmem:[#allocation3 + $0x3f4] ss:$24 sps:$4 sm:$0xff]   ;;  %v5574_v10 = vld [vmem:[#allocation3 + $0xf0] ss:$24 sps:$4 sm:$0xff]  }
  0x52   :  { %2506 = vmatprep.subr.bf16.mxu1 %v5566_v5  ;;  %v5575_v11 = vld [vmem:[#allocation3 + $0x3f0] ss:$24 sps:$4 sm:$0xff]   ;;  %v5576_v12 = vld [vmem:[#allocation3 + $0xc4] ss:$24 sps:$4 sm:$0xff]   ;;  %v5580_v14 = vld [vmem:[#allocation3 + $0xc0] ss:$24 sps:$4 sm:$0xff]  }
  0x53   :  { %v5578_v13 = vld [vmem:[#allocation3 + $0x3c4] ss:$24 sps:$4 sm:$0xff]   ;;  %v5581_v15 = vld [vmem:[#allocation3 + $0x3c0] ss:$24 sps:$4 sm:$0xff]   ;;  %v5582_v16 = vld [vmem:[#allocation3 + $0x94] ss:$24 sps:$4 sm:$0xff]  }
  0x54   :  { %2464 = vmatpush1.bf16.msra.mxu0 %v5568_v6  ;;  %v5584_v17 = vld [vmem:[#allocation3 + $0x394] ss:$24 sps:$4 sm:$0xff]   ;;  %v5586_v18 = vld [vmem:[#allocation3 + $0x90] ss:$24 sps:$4 sm:$0xff]   ;;  %v5588_v20 = vld [vmem:[#allocation3 + $0x64] ss:$24 sps:$4 sm:$0xff]  }
  0x55   :  { %2507 = vmatpush1.bf16.msra.mxu1 %v5569_v7  ;;  %2465 = vmatprep.subr.bf16.mxu0 %v5570_v8  ;;  %v5587_v19 = vld [vmem:[#allocation3 + $0x390] ss:$24 sps:$4 sm:$0xff]   ;;  %v5590_v21 = vld [vmem:[#allocation3 + $0x364] ss:$24 sps:$4 sm:$0xff]   ;;  %v5592_v22 = vld [vmem:[#allocation3 + $0x60] ss:$24 sps:$4 sm:$0xff]  }
  0x56   :  { %2508 = vmatprep.subr.bf16.mxu1 %v5572_v9  ;;  %v5593_v23 = vld [vmem:[#allocation3 + $0x360] ss:$24 sps:$4 sm:$0xff]   ;;  %v5594_v24 = vld [vmem:[#allocation3 + $0x34] ss:$24 sps:$4 sm:$0xff]   ;;  %v5598_v26 = vld [vmem:[#allocation3 + $0x30] ss:$24 sps:$4 sm:$0xff]  }
  0x57   :  { %v5596_v25 = vld [vmem:[#allocation3 + $0x334] ss:$24 sps:$4 sm:$0xff]   ;;  %v5599_v27 = vld [vmem:[#allocation3 + $0x330] ss:$24 sps:$4 sm:$0xff]   ;;  %v5600_v28 = vld [vmem:[#allocation3 + $0x4] ss:$24 sps:$4 sm:$0xff]  }
  0x58   :  { %2466 = vmatpush1.bf16.msra.mxu0 %v5574_v10  ;;  %v5602_v29 = vld [vmem:[#allocation3 + $0x304] ss:$24 sps:$4 sm:$0xff]   ;;  %v5604_v30 = vld [vmem:[#allocation3] ss:$24 sps:$4 sm:$0xff]   ;;  %v5606_v32 = vld [vmem:[#allocation3 + $0x2d4] ss:$24 sps:$4 sm:$0xff]  }
  0x59   :  { %2509 = vmatpush1.bf16.msra.mxu1 %v5575_v11  ;;  %2467 = vmatprep.subr.bf16.mxu0 %v5576_v12  ;;  %v5605_v31 = vld [vmem:[#allocation3 + $0x300] ss:$24 sps:$4 sm:$0xff]   ;;  %v5608_v33 = vld [vmem:[#allocation3 + $0x5d4] ss:$24 sps:$4 sm:$0xff]   ;;  %v5610_v34 = vld [vmem:[#allocation3 + $0x2d0] ss:$24 sps:$4 sm:$0xff]  }
  0x5a   :  { %2510 = vmatprep.subr.bf16.mxu1 %v5578_v13  ;;  %v5611_v35 = vld [vmem:[#allocation3 + $0x5d0] ss:$24 sps:$4 sm:$0xff]   ;;  %v5612_v36 = vld [vmem:[#allocation3 + $0x2a4] ss:$24 sps:$4 sm:$0xff]   ;;  %v5616_v38 = vld [vmem:[#allocation3 + $0x2a0] ss:$24 sps:$4 sm:$0xff]  }
  0x5b   :  { %v5614_v37 = vld [vmem:[#allocation3 + $0x5a4] ss:$24 sps:$4 sm:$0xff]   ;;  %v5617_v39 = vld [vmem:[#allocation3 + $0x5a0] ss:$24 sps:$4 sm:$0xff]   ;;  %v5618_v40 = vld [vmem:[#allocation3 + $0x274] ss:$24 sps:$4 sm:$0xff]  }
  0x5c   :  { %2468 = vmatpush1.bf16.msra.mxu0 %v5580_v14  ;;  %v5620_v41 = vld [vmem:[#allocation3 + $0x574] ss:$24 sps:$4 sm:$0xff]   ;;  %v5622_v42 = vld [vmem:[#allocation3 + $0x270] ss:$24 sps:$4 sm:$0xff]   ;;  %v5624_v44 = vld [vmem:[#allocation3 + $0x244] ss:$24 sps:$4 sm:$0xff]  }
  0x5d   :  { %2511 = vmatpush1.bf16.msra.mxu1 %v5581_v15  ;;  %2469 = vmatprep.subr.bf16.mxu0 %v5582_v16  ;;  %v5623_v43 = vld [vmem:[#allocation3 + $0x570] ss:$24 sps:$4 sm:$0xff]   ;;  %v5626_v45 = vld [vmem:[#allocation3 + $0x544] ss:$24 sps:$4 sm:$0xff]   ;;  %v5628_v50 = vld [vmem:[#allocation3 + $0x240] ss:$24 sps:$4 sm:$0xff]  }
  0x5e   :  { %2512 = vmatprep.subr.bf16.mxu1 %v5584_v17  ;;  %v134_v46 = vld [vmem:[%s6846_s0 + $0x8] sm:$0xff]  ;;  %v136_v48 = vld [vmem:[%s6846_s0 + $0x18] sm:$0xff]  ;;  %v133_v6 = vld [vmem:[%s6846_s0] sm:$0xff] }
  0x5f   :  { %v142_v47 = vld [vmem:[%s6846_s0 + $0x48] sm:$0xff]  ;;  %v144_v49 = vld [vmem:[%s6846_s0 + $0x58] sm:$0xff]  ;;  %v141_v7 = vld [vmem:[%s6846_s0 + $0x40] sm:$0xff] }
  0x60   :  { %2470 = vmatpush1.bf16.msra.mxu0 %v5586_v18  ;;  %v5629_v51 = vld [vmem:[#allocation3 + $0x540] ss:$24 sps:$4 sm:$0xff]   ;;  %v5630_v52 = vld [vmem:[#allocation3 + $0x214] ss:$24 sps:$4 sm:$0xff]   ;;  %v6674_v53 = vpack.c.bf16 %v142_v47, %v134_v46  ;;  %v6676_v54 = vpack.c.bf16 %v144_v49, %v136_v48  ;;  %v5634_v56 = vld [vmem:[#allocation3 + $0x210] ss:$24 sps:$4 sm:$0xff]   ;;  %v6692_v12 = vpack.c.bf16 %v141_v7, %v133_v6 }
  0x61   :  { %2513 = vmatpush1.bf16.msra.mxu1 %v5587_v19  ;;  %2471 = vmatprep.subr.bf16.mxu0 %v5588_v20  ;;  %v5632_v55 = vld [vmem:[#allocation3 + $0x514] ss:$24 sps:$4 sm:$0xff]   ;;  %v5635_v57 = vld [vmem:[#allocation3 + $0x510] ss:$24 sps:$4 sm:$0xff]   ;;  %v5636_v58 = vld [vmem:[#allocation3 + $0x1e4] ss:$24 sps:$4 sm:$0xff]  }
  0x62   :  { %2514 = vmatprep.subr.bf16.mxu1 %v5590_v21  ;;  %2493 = vmatprep.mubr.bf16.mxu0 %v6674_v53  ;;  %v5638_v59 = vld [vmem:[#allocation3 + $0x4e4] ss:$24 sps:$4 sm:$0xff]   ;;  %v5640_v60 = vld [vmem:[#allocation3 + $0x1e0] ss:$24 sps:$4 sm:$0xff]   ;;  %v5642_v62 = vld [vmem:[#allocation3 + $0x1b4] ss:$24 sps:$4 sm:$0xff]  }
  0x63   :  { %2536 = vmatprep.mubr.bf16.mxu1 %v6676_v54  ;;  %v5641_v61 = vld [vmem:[#allocation3 + $0x4e0] ss:$24 sps:$4 sm:$0xff]   ;;  %v5644_v63 = vld [vmem:[#allocation3 + $0x4b4] ss:$24 sps:$4 sm:$0xff]   ;;  %v5646_v0 = vld [vmem:[#allocation3 + $0x1b0] ss:$24 sps:$4 sm:$0xff]  }
  0x64   :  { %2472 = vmatpush1.bf16.msra.mxu0 %v5592_v22  ;;  %v5647_v1 = vld [vmem:[#allocation3 + $0x4b0] ss:$24 sps:$4 sm:$0xff]   ;;  %v5648_v2 = vld [vmem:[#allocation3 + $0x184] ss:$24 sps:$4 sm:$0xff]   ;;  %v5652_v4 = vld [vmem:[#allocation3 + $0x180] ss:$24 sps:$4 sm:$0xff]  }
  0x65   :  { %2515 = vmatpush1.bf16.msra.mxu1 %v5593_v23  ;;  %2473 = vmatprep.subr.bf16.mxu0 %v5594_v24  ;;  %v5650_v3 = vld [vmem:[#allocation3 + $0x484] ss:$24 sps:$4 sm:$0xff]   ;;  %v5653_v5 = vld [vmem:[#allocation3 + $0x480] ss:$24 sps:$4 sm:$0xff]   ;;  %v135_v8 = vld [vmem:[%s6846_s0 + $0x10] sm:$0xff] }
  0x66   :  { %2516 = vmatprep.subr.bf16.mxu1 %v5596_v25  ;;  %v143_v9 = vld [vmem:[%s6846_s0 + $0x50] sm:$0xff]  ;;  %v5662_v16 = vld [vmem:[#allocation3 + $0x724] ss:$24 sps:$4 sm:$0xff]   ;;  %v5660_v18 = vld [vmem:[#allocation3 + $0x720] ss:$24 sps:$4 sm:$0xff]  }
  0x67   :  { %v5656_v10 = vld [vmem:[#allocation3 + $0x754] ss:$24 sps:$4 sm:$0xff]   ;;  %v6694_v13 = vpack.c.bf16 %v143_v9, %v135_v8  ;;  %v5654_v14 = vld [vmem:[#allocation3 + $0x750] ss:$24 sps:$4 sm:$0xff]   ;;  %v5665_v17 = vld [vmem:[#allocation3 + $0xa24] ss:$24 sps:$4 sm:$0xff]  }
  0x68   :  { %2474 = vmatpush1.bf16.msra.mxu0 %v5598_v26  ;;  %v5659_v11 = vld [vmem:[#allocation3 + $0xa54] ss:$24 sps:$4 sm:$0xff]   ;;  %v5657_v15 = vld [vmem:[#allocation3 + $0xa50] ss:$24 sps:$4 sm:$0xff]   ;;  %v5663_v19 = vld [vmem:[#allocation3 + $0xa20] ss:$24 sps:$4 sm:$0xff]  }
  0x69   :  { %2517 = vmatpush1.bf16.msra.mxu1 %v5599_v27  ;;  %2475 = vmatprep.subr.bf16.mxu0 %v5600_v28  ;;  %v5668_v20 = vld [vmem:[#allocation3 + $0x6f4] ss:$24 sps:$4 sm:$0xff]   ;;  %v5666_v22 = vld [vmem:[#allocation3 + $0x6f0] ss:$24 sps:$4 sm:$0xff]   ;;  %v5674_v24 = vld [vmem:[#allocation3 + $0x6c4] ss:$24 sps:$4 sm:$0xff]  }
  0x6a   :  { %2518 = vmatprep.subr.bf16.mxu1 %v5602_v29  ;;  %v5671_v21 = vld [vmem:[#allocation3 + $0x9f4] ss:$24 sps:$4 sm:$0xff]   ;;  %v5669_v23 = vld [vmem:[#allocation3 + $0x9f0] ss:$24 sps:$4 sm:$0xff]   ;;  %v5677_v25 = vld [vmem:[#allocation3 + $0x9c4] ss:$24 sps:$4 sm:$0xff]  }
  0x6b   :  { %v5672_v26 = vld [vmem:[#allocation3 + $0x6c0] ss:$24 sps:$4 sm:$0xff]   ;;  %v5680_v28 = vld [vmem:[#allocation3 + $0x694] ss:$24 sps:$4 sm:$0xff]   ;;  %v5726_v6 = vld [vmem:[#allocation3 + $0x810] ss:$24 sps:$4 sm:$0xff]  }
  0x6c   :  { %2476 = vmatpush1.bf16.msra.mxu0 %v5604_v30  ;;  %v5675_v27 = vld [vmem:[#allocation3 + $0x9c0] ss:$24 sps:$4 sm:$0xff]   ;;  %v5683_v29 = vld [vmem:[#allocation3 + $0x994] ss:$24 sps:$4 sm:$0xff]   ;;  %v5678_v30 = vld [vmem:[#allocation3 + $0x690] ss:$24 sps:$4 sm:$0xff]  }
  0x6d   :  { %2519 = vmatpush1.bf16.msra.mxu1 %v5605_v31  ;;  %2477 = vmatprep.subr.bf16.mxu0 %v5606_v32  ;;  %v5681_v31 = vld [vmem:[#allocation3 + $0x990] ss:$24 sps:$4 sm:$0xff]   ;;  %v5686_v32 = vld [vmem:[#allocation3 + $0x664] ss:$24 sps:$4 sm:$0xff]   ;;  %v5696_v48 = vld [vmem:[#allocation3 + $0x600] ss:$24 sps:$4 sm:$0xff]  }
  0x6e   :  { %2520 = vmatprep.subr.bf16.mxu1 %v5608_v33  ;;  %v5689_v33 = vld [vmem:[#allocation3 + $0x964] ss:$24 sps:$4 sm:$0xff]   ;;  %v5699_v49 = vld [vmem:[#allocation3 + $0x900] ss:$24 sps:$4 sm:$0xff]   ;;  %v5729_v7 = vld [vmem:[#allocation3 + $0xb10] ss:$24 sps:$4 sm:$0xff]  }
  0x6f   :  { %v148_v46 = vld [vmem:[%s6846_s0 + $0x78] sm:$0xff] }
  0x70   :  { %2478 = vmatpush2.bf16.msra.mxu0 %v5610_v34  ;;  %v5684_v34 = vld [vmem:[#allocation3 + $0x660] ss:$24 sps:$4 sm:$0xff]   ;;  %v5734_v8 = vld [vmem:[#allocation3 + $0x7e4] ss:$24 sps:$4 sm:$0xff]  }
  0x71   :  { %2521 = vmatpush2.bf16.msra.mxu1 %v5611_v35  ;;  %2479 = vmatprep.subr.bf16.mxu0 %v5612_v36  ;;  %v5687_v35 = vld [vmem:[#allocation3 + $0x960] ss:$24 sps:$4 sm:$0xff]   ;;  %v5692_v36 = vld [vmem:[#allocation3 + $0x634] ss:$24 sps:$4 sm:$0xff]   ;;  %v5737_v9 = vld [vmem:[#allocation3 + $0xae4] ss:$24 sps:$4 sm:$0xff]  }
  0x72   :  { %2522 = vmatprep.subr.bf16.mxu1 %v5614_v37  ;;  %v5695_v37 = vld [vmem:[#allocation3 + $0x934] ss:$24 sps:$4 sm:$0xff]  }
  0x74   :  { %2480 = vmatpush2.bf16.msra.mxu0 %v5616_v38  ;;  %v5690_v38 = vld [vmem:[#allocation3 + $0x630] ss:$24 sps:$4 sm:$0xff]  }
  0x75   :  { %2523 = vmatpush2.bf16.msra.mxu1 %v5617_v39  ;;  %2481 = vmatprep.subr.bf16.mxu0 %v5618_v40  ;;  %v5693_v39 = vld [vmem:[#allocation3 + $0x930] ss:$24 sps:$4 sm:$0xff]  }
  0x76   :  { %2524 = vmatprep.subr.bf16.mxu1 %v5620_v41  ;;  %v138_v40 = vld [vmem:[%s6846_s0 + $0x28] sm:$0xff] }
  0x77   :  { %v146_v41 = vld [vmem:[%s6846_s0 + $0x68] sm:$0xff] }
  0x78   :  { %2482 = vmatpush2.bf16.msra.mxu0 %v5622_v42  ;;  %v140_v42 = vld [vmem:[%s6846_s0 + $0x38] sm:$0xff] }
  0x79   :  { %2525 = vmatpush2.bf16.msra.mxu1 %v5623_v43  ;;  %2483 = vmatprep.subr.bf16.mxu0 %v5624_v44  ;;  %v5698_v43 = vld [vmem:[#allocation3 + $0x604] ss:$24 sps:$4 sm:$0xff]   ;;  %v6712_v47 = vpack.c.bf16 %v148_v46, %v140_v42  ;;  %v5768_v42 = vld [vmem:[#allocation3 + $0xc8] ss:$24 sps:$4 sm:$0xff]  }
  0x7a   :  { %2526 = vmatprep.subr.bf16.mxu1 %v5626_v45  ;;  %v5701_v44 = vld [vmem:[#allocation3 + $0x904] ss:$24 sps:$4 sm:$0xff]   ;;  %v6707_v45 = vpack.c.bf16 %v146_v41, %v138_v40 }
  0x7b   :  { %v5770_v40 = vld [vmem:[#allocation3 + $0xcc] ss:$24 sps:$4 sm:$0xff]   ;;  %v5779_v46 = vld [vmem:[#allocation3 + $0x39c] ss:$24 sps:$4 sm:$0xff]  }
  0x7c   :  { %2484 = vmatpush2.bf16.msra.mxu0 %v5628_v50  ;;  %v5704_v50 = vld [vmem:[#allocation3 + $0x8d4] ss:$24 sps:$4 sm:$0xff]  }
  0x7d   :  { %2527 = vmatpush2.bf16.msra.mxu1 %v5629_v51  ;;  %2485 = vmatprep.subr.bf16.mxu0 %v5630_v52  ;;  %v5707_v51 = vld [vmem:[#allocation3 + $0xbd4] ss:$24 sps:$4 sm:$0xff]   ;;  %v5702_v52 = vld [vmem:[#allocation3 + $0x8d0] ss:$24 sps:$4 sm:$0xff]  }
  0x7e   :  { %2528 = vmatprep.subr.bf16.mxu1 %v5632_v55  ;;  %v5705_v55 = vld [vmem:[#allocation3 + $0xbd0] ss:$24 sps:$4 sm:$0xff]   ;;  %v5773_v41 = vld [vmem:[#allocation3 + $0x3cc] ss:$24 sps:$4 sm:$0xff]  }
  0x80   :  { %2486 = vmatpush2.bf16.msra.mxu0 %v5634_v56  ;;  %v5710_v56 = vld [vmem:[#allocation3 + $0x8a4] ss:$24 sps:$4 sm:$0xff]  }
  0x81   :  { %2529 = vmatpush2.bf16.msra.mxu1 %v5635_v57  ;;  %2487 = vmatprep.subr.bf16.mxu0 %v5636_v58  ;;  %v5713_v57 = vld [vmem:[#allocation3 + $0xba4] ss:$24 sps:$4 sm:$0xff]   ;;  %v5708_v58 = vld [vmem:[#allocation3 + $0x8a0] ss:$24 sps:$4 sm:$0xff]  }
  0x82   :  { %2530 = vmatprep.subr.bf16.mxu1 %v5638_v59  ;;  %v5711_v59 = vld [vmem:[#allocation3 + $0xba0] ss:$24 sps:$4 sm:$0xff]  }
  0x84   :  { %2488 = vmatpush2.bf16.msra.mxu0 %v5640_v60  ;;  %v5716_v60 = vld [vmem:[#allocation3 + $0x874] ss:$24 sps:$4 sm:$0xff]  }
  0x85   :  { %2531 = vmatpush2.bf16.msra.mxu1 %v5641_v61  ;;  %2489 = vmatprep.subr.bf16.mxu0 %v5642_v62  ;;  %v5719_v61 = vld [vmem:[#allocation3 + $0xb74] ss:$24 sps:$4 sm:$0xff]   ;;  %v5714_v62 = vld [vmem:[#allocation3 + $0x870] ss:$24 sps:$4 sm:$0xff]  }
  0x86   :  { %2532 = vmatprep.subr.bf16.mxu1 %v5644_v63  ;;  %v5717_v63 = vld [vmem:[#allocation3 + $0xb70] ss:$24 sps:$4 sm:$0xff]  }
  0x88   :  { %2490 = vmatpush2.bf16.msra.mxu0 %v5646_v0  ;;  %v5722_v0 = vld [vmem:[#allocation3 + $0x844] ss:$24 sps:$4 sm:$0xff]  }
  0x89   :  { %2533 = vmatpush2.bf16.msra.mxu1 %v5647_v1  ;;  %2491 = vmatprep.subr.bf16.mxu0 %v5648_v2  ;;  %v5725_v1 = vld [vmem:[#allocation3 + $0xb44] ss:$24 sps:$4 sm:$0xff]   ;;  %v5720_v2 = vld [vmem:[#allocation3 + $0x840] ss:$24 sps:$4 sm:$0xff]  }
  0x8a   :  { %2534 = vmatprep.subr.bf16.mxu1 %v5650_v3  ;;  %v5723_v3 = vld [vmem:[#allocation3 + $0xb40] ss:$24 sps:$4 sm:$0xff]  }
  0x8c   :  { %2492 = vmatpush2.bf16.msra.mxu0 %v5652_v4  ;;  %v5728_v4 = vld [vmem:[#allocation3 + $0x814] ss:$24 sps:$4 sm:$0xff]  }
  0x8d   :  { %2535 = vmatpush2.bf16.msra.mxu1 %v5653_v5  ;;  %2547 = vmatprep.subr.bf16.mxu0 %v5656_v10  ;;  %v5731_v5 = vld [vmem:[#allocation3 + $0xb14] ss:$24 sps:$4 sm:$0xff]   ;;  %v5732_v10 = vld [vmem:[#allocation3 + $0x7e0] ss:$24 sps:$4 sm:$0xff]  }
  0x8e   :  { %2590 = vmatprep.subr.bf16.mxu1 %v5659_v11  ;;  %v5735_v11 = vld [vmem:[#allocation3 + $0xae0] ss:$24 sps:$4 sm:$0xff]  }
  0x8f   :  { %2494 = vmatmul.mubr.bf16.vlgmr.msra.gmra.mxu0 %v6692_v12 }
  0x90   :  { %2537 = vmatmul.mubr.bf16.vlgmr.msra.gmra.mxu1 %v6694_v13  ;;  %2548 = vmatpush1.bf16.msra.mxu0 %v5654_v14  ;;  %v5740_v14 = vld [vmem:[#allocation3 + $0x7b4] ss:$24 sps:$4 sm:$0xff]  }
  0x91   :  { %2591 = vmatpush1.bf16.msra.mxu1 %v5657_v15  ;;  %2549 = vmatprep.subr.bf16.mxu0 %v5662_v16  ;;  %v5743_v15 = vld [vmem:[#allocation3 + $0xab4] ss:$24 sps:$4 sm:$0xff]   ;;  %v5738_v16 = vld [vmem:[#allocation3 + $0x7b0] ss:$24 sps:$4 sm:$0xff]  }
  0x92   :  { %2592 = vmatprep.subr.bf16.mxu1 %v5665_v17  ;;  %2579 = vmatprep.mubr.bf16.mxu0 %v6707_v45  ;;  %v5741_v17 = vld [vmem:[#allocation3 + $0xab0] ss:$24 sps:$4 sm:$0xff]  }
  0x93   :  { %2622 = vmatprep.mubr.bf16.mxu1 %v6712_v47 }
  0x94   :  { %2550 = vmatpush1.bf16.msra.mxu0 %v5660_v18  ;;  %v5746_v18 = vld [vmem:[#allocation3 + $0x784] ss:$24 sps:$4 sm:$0xff]  }
  0x95   :  { %2593 = vmatpush1.bf16.msra.mxu1 %v5663_v19  ;;  %2551 = vmatprep.subr.bf16.mxu0 %v5668_v20  ;;  %v5749_v19 = vld [vmem:[#allocation3 + $0xa84] ss:$24 sps:$4 sm:$0xff]   ;;  %v5744_v20 = vld [vmem:[#allocation3 + $0x780] ss:$24 sps:$4 sm:$0xff]  }
  0x96   :  { %2594 = vmatprep.subr.bf16.mxu1 %v5671_v21  ;;  %v5747_v21 = vld [vmem:[#allocation3 + $0xa80] ss:$24 sps:$4 sm:$0xff]  }
  0x98   :  { %2552 = vmatpush1.bf16.msra.mxu0 %v5666_v22  ;;  %v137_v22 = vld [vmem:[%s6846_s0 + $0x20] sm:$0xff] }
  0x99   :  { %2595 = vmatpush1.bf16.msra.mxu1 %v5669_v23  ;;  %2553 = vmatprep.subr.bf16.mxu0 %v5674_v24  ;;  %v145_v23 = vld [vmem:[%s6846_s0 + $0x60] sm:$0xff]  ;;  %v139_v24 = vld [vmem:[%s6846_s0 + $0x30] sm:$0xff] }
  0x9a   :  { %2596 = vmatprep.subr.bf16.mxu1 %v5677_v25  ;;  %v147_v25 = vld [vmem:[%s6846_s0 + $0x70] sm:$0xff] }
  0x9c   :  { %2554 = vmatpush1.bf16.msra.mxu0 %v5672_v26  ;;  %v5752_v26 = vld [vmem:[#allocation3 + $0x15c] ss:$24 sps:$4 sm:$0xff]  }
  0x9d   :  { %2597 = vmatpush1.bf16.msra.mxu1 %v5675_v27  ;;  %2555 = vmatprep.subr.bf16.mxu0 %v5680_v28  ;;  %v5755_v27 = vld [vmem:[#allocation3 + $0x45c] ss:$24 sps:$4 sm:$0xff]   ;;  %v6728_v28 = vpack.c.bf16 %v145_v23, %v137_v22  ;;  %v5830_v22 = vld [vmem:[#allocation3 + $0x1ec] ss:$24 sps:$4 sm:$0xff]  }
  0x9e   :  { %2598 = vmatprep.subr.bf16.mxu1 %v5683_v29  ;;  %v6730_v29 = vpack.c.bf16 %v147_v25, %v139_v24  ;;  %v5833_v23 = vld [vmem:[#allocation3 + $0x4ec] ss:$24 sps:$4 sm:$0xff]   ;;  %v5828_v24 = vld [vmem:[#allocation3 + $0x1e8] ss:$24 sps:$4 sm:$0xff]  }
  0x9f   :  { %v5831_v25 = vld [vmem:[#allocation3 + $0x4e8] ss:$24 sps:$4 sm:$0xff]  }
  0xa0   :  { %2556 = vmatpush1.bf16.msra.mxu0 %v5678_v30  ;;  %v5750_v30 = vld [vmem:[#allocation3 + $0x158] ss:$24 sps:$4 sm:$0xff]  }
  0xa1   :  { %2599 = vmatpush1.bf16.msra.mxu1 %v5681_v31  ;;  %2557 = vmatprep.subr.bf16.mxu0 %v5686_v32  ;;  %v5753_v31 = vld [vmem:[#allocation3 + $0x458] ss:$24 sps:$4 sm:$0xff]   ;;  %v5758_v32 = vld [vmem:[#allocation3 + $0x12c] ss:$24 sps:$4 sm:$0xff]  }
  0xa2   :  { %2600 = vmatprep.subr.bf16.mxu1 %v5689_v33  ;;  %v5761_v33 = vld [vmem:[#allocation3 + $0x42c] ss:$24 sps:$4 sm:$0xff]  }
  0xa4   :  { %2558 = vmatpush1.bf16.msra.mxu0 %v5684_v34  ;;  %v5756_v34 = vld [vmem:[#allocation3 + $0x128] ss:$24 sps:$4 sm:$0xff]  }
  0xa5   :  { %2601 = vmatpush1.bf16.msra.mxu1 %v5687_v35  ;;  %2559 = vmatprep.subr.bf16.mxu0 %v5692_v36  ;;  %v5759_v35 = vld [vmem:[#allocation3 + $0x428] ss:$24 sps:$4 sm:$0xff]   ;;  %v5764_v36 = vld [vmem:[#allocation3 + $0xfc] ss:$24 sps:$4 sm:$0xff]  }
  0xa6   :  { %2602 = vmatprep.subr.bf16.mxu1 %v5695_v37  ;;  %v5767_v37 = vld [vmem:[#allocation3 + $0x3fc] ss:$24 sps:$4 sm:$0xff]  }
  0xa8   :  { %2560 = vmatpush1.bf16.msra.mxu0 %v5690_v38  ;;  %v5762_v38 = vld [vmem:[#allocation3 + $0xf8] ss:$24 sps:$4 sm:$0xff]  }
  0xa9   :  { %2603 = vmatpush1.bf16.msra.mxu1 %v5693_v39  ;;  %2561 = vmatprep.subr.bf16.mxu0 %v5698_v43  ;;  %v5765_v39 = vld [vmem:[#allocation3 + $0x3f8] ss:$24 sps:$4 sm:$0xff]   ;;  %v5771_v43 = vld [vmem:[#allocation3 + $0x3c8] ss:$24 sps:$4 sm:$0xff]  }
  0xaa   :  { %2604 = vmatprep.subr.bf16.mxu1 %v5701_v44  ;;  %v5776_v44 = vld [vmem:[#allocation3 + $0x9c] ss:$24 sps:$4 sm:$0xff]  }
  0xac   :  { %2562 = vmatpush1.bf16.msra.mxu0 %v5696_v48  ;;  %v5774_v48 = vld [vmem:[#allocation3 + $0x98] ss:$24 sps:$4 sm:$0xff]  }
  0xad   :  { %2605 = vmatpush1.bf16.msra.mxu1 %v5699_v49  ;;  %2563 = vmatprep.subr.bf16.mxu0 %v5704_v50  ;;  %v5777_v49 = vld [vmem:[#allocation3 + $0x398] ss:$24 sps:$4 sm:$0xff]   ;;  %v5782_v50 = vld [vmem:[#allocation3 + $0x6c] ss:$24 sps:$4 sm:$0xff]  }
  0xae   :  { %2606 = vmatprep.subr.bf16.mxu1 %v5707_v51  ;;  %v5785_v51 = vld [vmem:[#allocation3 + $0x36c] ss:$24 sps:$4 sm:$0xff]  }
  0xb0   :  { %2564 = vmatpush2.bf16.msra.mxu0 %v5702_v52  ;;  %v5780_v52 = vld [vmem:[#allocation3 + $0x68] ss:$24 sps:$4 sm:$0xff]  }
  0xb1   :  { %2607 = vmatpush2.bf16.msra.mxu1 %v5705_v55  ;;  %2565 = vmatprep.subr.bf16.mxu0 %v5710_v56  ;;  %v5783_v55 = vld [vmem:[#allocation3 + $0x368] ss:$24 sps:$4 sm:$0xff]   ;;  %v5788_v56 = vld [vmem:[#allocation3 + $0x3c] ss:$24 sps:$4 sm:$0xff]  }
  0xb2   :  { %2608 = vmatprep.subr.bf16.mxu1 %v5713_v57  ;;  %v5791_v57 = vld [vmem:[#allocation3 + $0x33c] ss:$24 sps:$4 sm:$0xff]  }
  0xb4   :  { %2566 = vmatpush2.bf16.msra.mxu0 %v5708_v58  ;;  %v5786_v58 = vld [vmem:[#allocation3 + $0x38] ss:$24 sps:$4 sm:$0xff]  }
  0xb5   :  { %2609 = vmatpush2.bf16.msra.mxu1 %v5711_v59  ;;  %2567 = vmatprep.subr.bf16.mxu0 %v5716_v60  ;;  %v5789_v59 = vld [vmem:[#allocation3 + $0x338] ss:$24 sps:$4 sm:$0xff]   ;;  %v5794_v60 = vld [vmem:[#allocation3 + $0xc] ss:$24 sps:$4 sm:$0xff]  }
  0xb6   :  { %2610 = vmatprep.subr.bf16.mxu1 %v5719_v61  ;;  %v5797_v61 = vld [vmem:[#allocation3 + $0x30c] ss:$24 sps:$4 sm:$0xff]  }
  0xb8   :  { %2568 = vmatpush2.bf16.msra.mxu0 %v5714_v62  ;;  %v5792_v62 = vld [vmem:[#allocation3 + $0x8] ss:$24 sps:$4 sm:$0xff]  }
  0xb9   :  { %2611 = vmatpush2.bf16.msra.mxu1 %v5717_v63  ;;  %2569 = vmatprep.subr.bf16.mxu0 %v5722_v0  ;;  %v5795_v63 = vld [vmem:[#allocation3 + $0x308] ss:$24 sps:$4 sm:$0xff]   ;;  %v5800_v0 = vld [vmem:[#allocation3 + $0x2dc] ss:$24 sps:$4 sm:$0xff]  }
  0xba   :  { %2612 = vmatprep.subr.bf16.mxu1 %v5725_v1  ;;  %v5803_v1 = vld [vmem:[#allocation3 + $0x5dc] ss:$24 sps:$4 sm:$0xff]  }
  0xbc   :  { %2570 = vmatpush2.bf16.msra.mxu0 %v5720_v2  ;;  %v5798_v2 = vld [vmem:[#allocation3 + $0x2d8] ss:$24 sps:$4 sm:$0xff]  }
  0xbd   :  { %2613 = vmatpush2.bf16.msra.mxu1 %v5723_v3  ;;  %2571 = vmatprep.subr.bf16.mxu0 %v5728_v4  ;;  %v5801_v3 = vld [vmem:[#allocation3 + $0x5d8] ss:$24 sps:$4 sm:$0xff]   ;;  %v5806_v4 = vld [vmem:[#allocation3 + $0x2ac] ss:$24 sps:$4 sm:$0xff]  }
  0xbe   :  { %2614 = vmatprep.subr.bf16.mxu1 %v5731_v5  ;;  %v5809_v5 = vld [vmem:[#allocation3 + $0x5ac] ss:$24 sps:$4 sm:$0xff]  }
  0xc0   :  { %2572 = vmatpush2.bf16.msra.mxu0 %v5726_v6  ;;  %v5804_v6 = vld [vmem:[#allocation3 + $0x2a8] ss:$24 sps:$4 sm:$0xff]  }
  0xc1   :  { %2615 = vmatpush2.bf16.msra.mxu1 %v5729_v7  ;;  %2573 = vmatprep.subr.bf16.mxu0 %v5734_v8  ;;  %v5807_v7 = vld [vmem:[#allocation3 + $0x5a8] ss:$24 sps:$4 sm:$0xff]   ;;  %v5812_v8 = vld [vmem:[#allocation3 + $0x27c] ss:$24 sps:$4 sm:$0xff]  }
  0xc2   :  { %2616 = vmatprep.subr.bf16.mxu1 %v5737_v9  ;;  %v5815_v9 = vld [vmem:[#allocation3 + $0x57c] ss:$24 sps:$4 sm:$0xff]  }
  0xc4   :  { %2574 = vmatpush2.bf16.msra.mxu0 %v5732_v10  ;;  %v5810_v10 = vld [vmem:[#allocation3 + $0x278] ss:$24 sps:$4 sm:$0xff]  }
  0xc5   :  { %2617 = vmatpush2.bf16.msra.mxu1 %v5735_v11  ;;  %2575 = vmatprep.subr.bf16.mxu0 %v5740_v14  ;;  %v5813_v11 = vld [vmem:[#allocation3 + $0x578] ss:$24 sps:$4 sm:$0xff]   ;;  %v5818_v14 = vld [vmem:[#allocation3 + $0x24c] ss:$24 sps:$4 sm:$0xff]  }
  0xc6   :  { %2618 = vmatprep.subr.bf16.mxu1 %v5743_v15  ;;  %v5821_v15 = vld [vmem:[#allocation3 + $0x54c] ss:$24 sps:$4 sm:$0xff]  }
  0xc8   :  { %2576 = vmatpush2.bf16.msra.mxu0 %v5738_v16  ;;  %v5816_v16 = vld [vmem:[#allocation3 + $0x248] ss:$24 sps:$4 sm:$0xff]  }
  0xc9   :  { %2619 = vmatpush2.bf16.msra.mxu1 %v5741_v17  ;;  %2577 = vmatprep.subr.bf16.mxu0 %v5746_v18  ;;  %v5819_v17 = vld [vmem:[#allocation3 + $0x548] ss:$24 sps:$4 sm:$0xff]   ;;  %v5824_v18 = vld [vmem:[#allocation3 + $0x21c] ss:$24 sps:$4 sm:$0xff]  }
  0xca   :  { %2620 = vmatprep.subr.bf16.mxu1 %v5749_v19  ;;  %v5827_v19 = vld [vmem:[#allocation3 + $0x51c] ss:$24 sps:$4 sm:$0xff]  }
  0xcc   :  { %2578 = vmatpush2.bf16.msra.mxu0 %v5744_v20  ;;  %v5822_v20 = vld [vmem:[#allocation3 + $0x218] ss:$24 sps:$4 sm:$0xff]  }
  0xcd   :  { %2621 = vmatpush2.bf16.msra.mxu1 %v5747_v21  ;;  %2633 = vmatprep.subr.bf16.mxu0 %v5752_v26  ;;  %v5825_v21 = vld [vmem:[#allocation3 + $0x518] ss:$24 sps:$4 sm:$0xff]   ;;  %v5836_v26 = vld [vmem:[#allocation3 + $0x1bc] ss:$24 sps:$4 sm:$0xff]  }
  0xce   :  { %2676 = vmatprep.subr.bf16.mxu1 %v5755_v27  ;;  %v5839_v27 = vld [vmem:[#allocation3 + $0x4bc] ss:$24 sps:$4 sm:$0xff]  }
  0xcf   :  { %2580 = vmatmul.mubr.bf16.vlgmr.msra.gmra.mxu0 %v6728_v28 }
  0xd0   :  { %2623 = vmatmul.mubr.bf16.vlgmr.msra.gmra.mxu1 %v6730_v29  ;;  %2634 = vmatpush1.bf16.msra.mxu0 %v5750_v30  ;;  %v5834_v30 = vld [vmem:[#allocation3 + $0x1b8] ss:$24 sps:$4 sm:$0xff]  }
  0xd1   :  { %2677 = vmatpush1.bf16.msra.mxu1 %v5753_v31  ;;  %2635 = vmatprep.subr.bf16.mxu0 %v5758_v32  ;;  %v5837_v31 = vld [vmem:[#allocation3 + $0x4b8] ss:$24 sps:$4 sm:$0xff]   ;;  %v5842_v32 = vld [vmem:[#allocation3 + $0x18c] ss:$24 sps:$4 sm:$0xff]  }
  0xd2   :  { %2678 = vmatprep.subr.bf16.mxu1 %v5761_v33  ;;  %2665 = vmatprep.mubr.bf16.mxu0 %v6674_v53  ;;  %v5845_v33 = vld [vmem:[#allocation3 + $0x48c] ss:$24 sps:$4 sm:$0xff]  }
  0xd3   :  { %2708 = vmatprep.mubr.bf16.mxu1 %v6676_v54 }
  0xd4   :  { %2636 = vmatpush1.bf16.msra.mxu0 %v5756_v34  ;;  %v5840_v34 = vld [vmem:[#allocation3 + $0x188] ss:$24 sps:$4 sm:$0xff]  }
  0xd5   :  { %2679 = vmatpush1.bf16.msra.mxu1 %v5759_v35  ;;  %2637 = vmatprep.subr.bf16.mxu0 %v5764_v36  ;;  %v5843_v35 = vld [vmem:[#allocation3 + $0x488] ss:$24 sps:$4 sm:$0xff]   ;;  %v5848_v36 = vld [vmem:[#allocation3 + $0x75c] ss:$24 sps:$4 sm:$0xff]  }
  0xd6   :  { %2680 = vmatprep.subr.bf16.mxu1 %v5767_v37  ;;  %v5851_v37 = vld [vmem:[#allocation3 + $0xa5c] ss:$24 sps:$4 sm:$0xff]  }
  0xd8   :  { %2638 = vmatpush1.bf16.msra.mxu0 %v5762_v38  ;;  %v5846_v38 = vld [vmem:[#allocation3 + $0x758] ss:$24 sps:$4 sm:$0xff]  }
  0xd9   :  { %2681 = vmatpush1.bf16.msra.mxu1 %v5765_v39  ;;  %2639 = vmatprep.subr.bf16.mxu0 %v5770_v40  ;;  %v5849_v39 = vld [vmem:[#allocation3 + $0xa58] ss:$24 sps:$4 sm:$0xff]   ;;  %v5854_v40 = vld [vmem:[#allocation3 + $0x72c] ss:$24 sps:$4 sm:$0xff]  }
  0xda   :  { %2682 = vmatprep.subr.bf16.mxu1 %v5773_v41  ;;  %v5857_v41 = vld [vmem:[#allocation3 + $0xa2c] ss:$24 sps:$4 sm:$0xff]  }
  0xdc   :  { %2640 = vmatpush1.bf16.msra.mxu0 %v5768_v42  ;;  %v5852_v42 = vld [vmem:[#allocation3 + $0x728] ss:$24 sps:$4 sm:$0xff]  }
  0xdd   :  { %2683 = vmatpush1.bf16.msra.mxu1 %v5771_v43  ;;  %2641 = vmatprep.subr.bf16.mxu0 %v5776_v44  ;;  %v5855_v43 = vld [vmem:[#allocation3 + $0xa28] ss:$24 sps:$4 sm:$0xff]   ;;  %v5860_v44 = vld [vmem:[#allocation3 + $0x6fc] ss:$24 sps:$4 sm:$0xff]  }
  0xde   :  { %2684 = vmatprep.subr.bf16.mxu1 %v5779_v46  ;;  %v5863_v46 = vld [vmem:[#allocation3 + $0x9fc] ss:$24 sps:$4 sm:$0xff]  }
  0xe0   :  { %2642 = vmatpush1.bf16.msra.mxu0 %v5774_v48  ;;  %v5858_v48 = vld [vmem:[#allocation3 + $0x6f8] ss:$24 sps:$4 sm:$0xff]  }
  0xe1   :  { %2685 = vmatpush1.bf16.msra.mxu1 %v5777_v49  ;;  %2643 = vmatprep.subr.bf16.mxu0 %v5782_v50  ;;  %v5861_v49 = vld [vmem:[#allocation3 + $0x9f8] ss:$24 sps:$4 sm:$0xff]   ;;  %v5866_v50 = vld [vmem:[#allocation3 + $0x6cc] ss:$24 sps:$4 sm:$0xff]  }
  0xe2   :  { %2686 = vmatprep.subr.bf16.mxu1 %v5785_v51  ;;  %v5869_v51 = vld [vmem:[#allocation3 + $0x9cc] ss:$24 sps:$4 sm:$0xff]  }
  0xe4   :  { %2644 = vmatpush1.bf16.msra.mxu0 %v5780_v52  ;;  %v5864_v52 = vld [vmem:[#allocation3 + $0x6c8] ss:$24 sps:$4 sm:$0xff]  }
  0xe5   :  { %2687 = vmatpush1.bf16.msra.mxu1 %v5783_v55  ;;  %2645 = vmatprep.subr.bf16.mxu0 %v5788_v56  ;;  %v5867_v55 = vld [vmem:[#allocation3 + $0x9c8] ss:$24 sps:$4 sm:$0xff]   ;;  %v5872_v56 = vld [vmem:[#allocation3 + $0x69c] ss:$24 sps:$4 sm:$0xff]  }
  0xe6   :  { %2688 = vmatprep.subr.bf16.mxu1 %v5791_v57  ;;  %v5875_v57 = vld [vmem:[#allocation3 + $0x99c] ss:$24 sps:$4 sm:$0xff]  }
  0xe8   :  { %2646 = vmatpush1.bf16.msra.mxu0 %v5786_v58  ;;  %v5870_v58 = vld [vmem:[#allocation3 + $0x698] ss:$24 sps:$4 sm:$0xff]  }
  0xe9   :  { %2689 = vmatpush1.bf16.msra.mxu1 %v5789_v59  ;;  %2647 = vmatprep.subr.bf16.mxu0 %v5794_v60  ;;  %v5873_v59 = vld [vmem:[#allocation3 + $0x998] ss:$24 sps:$4 sm:$0xff]   ;;  %v5878_v60 = vld [vmem:[#allocation3 + $0x66c] ss:$24 sps:$4 sm:$0xff]  }
  0xea   :  { %2690 = vmatprep.subr.bf16.mxu1 %v5797_v61  ;;  %v5881_v61 = vld [vmem:[#allocation3 + $0x96c] ss:$24 sps:$4 sm:$0xff]  }
  0xec   :  { %2648 = vmatpush1.bf16.msra.mxu0 %v5792_v62  ;;  %v5876_v62 = vld [vmem:[#allocation3 + $0x668] ss:$24 sps:$4 sm:$0xff]  }
  0xed   :  { %2691 = vmatpush1.bf16.msra.mxu1 %v5795_v63  ;;  %2649 = vmatprep.subr.bf16.mxu0 %v5800_v0  ;;  %v5879_v63 = vld [vmem:[#allocation3 + $0x968] ss:$24 sps:$4 sm:$0xff]   ;;  %v5884_v0 = vld [vmem:[#allocation3 + $0x63c] ss:$24 sps:$4 sm:$0xff]  }
  0xee   :  { %2692 = vmatprep.subr.bf16.mxu1 %v5803_v1  ;;  %v5887_v1 = vld [vmem:[#allocation3 + $0x93c] ss:$24 sps:$4 sm:$0xff]  }
  0xf0   :  { %2650 = vmatpush2.bf16.msra.mxu0 %v5798_v2  ;;  %v5882_v2 = vld [vmem:[#allocation3 + $0x638] ss:$24 sps:$4 sm:$0xff]  }
  0xf1   :  { %2693 = vmatpush2.bf16.msra.mxu1 %v5801_v3  ;;  %2651 = vmatprep.subr.bf16.mxu0 %v5806_v4  ;;  %v5885_v3 = vld [vmem:[#allocation3 + $0x938] ss:$24 sps:$4 sm:$0xff]   ;;  %v5890_v4 = vld [vmem:[#allocation3 + $0x60c] ss:$24 sps:$4 sm:$0xff]  }
  0xf2   :  { %2694 = vmatprep.subr.bf16.mxu1 %v5809_v5  ;;  %v5893_v5 = vld [vmem:[#allocation3 + $0x90c] ss:$24 sps:$4 sm:$0xff]  }
  0xf4   :  { %2652 = vmatpush2.bf16.msra.mxu0 %v5804_v6  ;;  %v5888_v6 = vld [vmem:[#allocation3 + $0x608] ss:$24 sps:$4 sm:$0xff]  }
  0xf5   :  { %2695 = vmatpush2.bf16.msra.mxu1 %v5807_v7  ;;  %2653 = vmatprep.subr.bf16.mxu0 %v5812_v8  ;;  %v5891_v7 = vld [vmem:[#allocation3 + $0x908] ss:$24 sps:$4 sm:$0xff]   ;;  %v5896_v8 = vld [vmem:[#allocation3 + $0x8dc] ss:$24 sps:$4 sm:$0xff]  }
  0xf6   :  { %2696 = vmatprep.subr.bf16.mxu1 %v5815_v9  ;;  %v5899_v9 = vld [vmem:[#allocation3 + $0xbdc] ss:$24 sps:$4 sm:$0xff]  }
  0xf8   :  { %2654 = vmatpush2.bf16.msra.mxu0 %v5810_v10  ;;  %v5894_v10 = vld [vmem:[#allocation3 + $0x8d8] ss:$24 sps:$4 sm:$0xff]  }
  0xf9   :  { %2697 = vmatpush2.bf16.msra.mxu1 %v5813_v11  ;;  %2655 = vmatprep.subr.bf16.mxu0 %v5818_v14  ;;  %v5897_v11 = vld [vmem:[#allocation3 + $0xbd8] ss:$24 sps:$4 sm:$0xff]   ;;  %v5902_v14 = vld [vmem:[#allocation3 + $0x8ac] ss:$24 sps:$4 sm:$0xff]  }
  0xfa   :  { %2698 = vmatprep.subr.bf16.mxu1 %v5821_v15  ;;  %v5905_v15 = vld [vmem:[#allocation3 + $0xbac] ss:$24 sps:$4 sm:$0xff]  }
  0xfc   :  { %2656 = vmatpush2.bf16.msra.mxu0 %v5816_v16  ;;  %v5900_v16 = vld [vmem:[#allocation3 + $0x8a8] ss:$24 sps:$4 sm:$0xff]  }
  0xfd   :  { %2699 = vmatpush2.bf16.msra.mxu1 %v5819_v17  ;;  %2657 = vmatprep.subr.bf16.mxu0 %v5824_v18  ;;  %v5903_v17 = vld [vmem:[#allocation3 + $0xba8] ss:$24 sps:$4 sm:$0xff]   ;;  %v5908_v18 = vld [vmem:[#allocation3 + $0x87c] ss:$24 sps:$4 sm:$0xff]  }
  0xfe   :  { %2700 = vmatprep.subr.bf16.mxu1 %v5827_v19  ;;  %v5911_v19 = vld [vmem:[#allocation3 + $0xb7c] ss:$24 sps:$4 sm:$0xff]  }
 0x100   :  { %2658 = vmatpush2.bf16.msra.mxu0 %v5822_v20  ;;  %v5906_v20 = vld [vmem:[#allocation3 + $0x878] ss:$24 sps:$4 sm:$0xff]  }
 0x101   :  { %2701 = vmatpush2.bf16.msra.mxu1 %v5825_v21  ;;  %2659 = vmatprep.subr.bf16.mxu0 %v5830_v22  ;;  %v5909_v21 = vld [vmem:[#allocation3 + $0xb78] ss:$24 sps:$4 sm:$0xff]   ;;  %v5914_v22 = vld [vmem:[#allocation3 + $0x84c] ss:$24 sps:$4 sm:$0xff]  }
 0x102   :  { %2702 = vmatprep.subr.bf16.mxu1 %v5833_v23  ;;  %v5917_v23 = vld [vmem:[#allocation3 + $0xb4c] ss:$24 sps:$4 sm:$0xff]  }
 0x104   :  { %2660 = vmatpush2.bf16.msra.mxu0 %v5828_v24  ;;  %v5912_v24 = vld [vmem:[#allocation3 + $0x848] ss:$24 sps:$4 sm:$0xff]  }
 0x105   :  { %2703 = vmatpush2.bf16.msra.mxu1 %v5831_v25  ;;  %2661 = vmatprep.subr.bf16.mxu0 %v5836_v26  ;;  %v5915_v25 = vld [vmem:[#allocation3 + $0xb48] ss:$24 sps:$4 sm:$0xff]   ;;  %v5920_v26 = vld [vmem:[#allocation3 + $0x81c] ss:$24 sps:$4 sm:$0xff]  }
 0x106   :  { %2704 = vmatprep.subr.bf16.mxu1 %v5839_v27  ;;  %v5923_v27 = vld [vmem:[#allocation3 + $0xb1c] ss:$24 sps:$4 sm:$0xff]  }
 0x108   :  { %2662 = vmatpush2.bf16.msra.mxu0 %v5834_v30  ;;  %v5918_v30 = vld [vmem:[#allocation3 + $0x818] ss:$24 sps:$4 sm:$0xff]  }
 0x109   :  { %2705 = vmatpush2.bf16.msra.mxu1 %v5837_v31  ;;  %2663 = vmatprep.subr.bf16.mxu0 %v5842_v32  ;;  %v5921_v31 = vld [vmem:[#allocation3 + $0xb18] ss:$24 sps:$4 sm:$0xff]   ;;  %v5926_v32 = vld [vmem:[#allocation3 + $0x7ec] ss:$24 sps:$4 sm:$0xff]  }
 0x10a   :  { %2706 = vmatprep.subr.bf16.mxu1 %v5845_v33  ;;  %v5929_v33 = vld [vmem:[#allocation3 + $0xaec] ss:$24 sps:$4 sm:$0xff]  }
 0x10c   :  { %2664 = vmatpush2.bf16.msra.mxu0 %v5840_v34  ;;  %v5924_v34 = vld [vmem:[#allocation3 + $0x7e8] ss:$24 sps:$4 sm:$0xff]  }
 0x10d   :  { %2707 = vmatpush2.bf16.msra.mxu1 %v5843_v35  ;;  %2719 = vmatprep.subr.bf16.mxu0 %v5848_v36  ;;  %v5927_v35 = vld [vmem:[#allocation3 + $0xae8] ss:$24 sps:$4 sm:$0xff]   ;;  %v5932_v36 = vld [vmem:[#allocation3 + $0x7bc] ss:$24 sps:$4 sm:$0xff]  }
 0x10e   :  { %2762 = vmatprep.subr.bf16.mxu1 %v5851_v37  ;;  %v5935_v37 = vld [vmem:[#allocation3 + $0xabc] ss:$24 sps:$4 sm:$0xff]  }
 0x10f   :  { %2666 = vmatmul.mubr.bf16.vlgmr.msra.gmra.mxu0 %v6692_v12 }
 0x110   :  { %2709 = vmatmul.mubr.bf16.vlgmr.msra.gmra.mxu1 %v6694_v13  ;;  %2720 = vmatpush1.bf16.msra.mxu0 %v5846_v38  ;;  %v5930_v38 = vld [vmem:[#allocation3 + $0x7b8] ss:$24 sps:$4 sm:$0xff]  }
 0x111   :  { %2763 = vmatpush1.bf16.msra.mxu1 %v5849_v39  ;;  %2721 = vmatprep.subr.bf16.mxu0 %v5854_v40  ;;  %v5933_v39 = vld [vmem:[#allocation3 + $0xab8] ss:$24 sps:$4 sm:$0xff]   ;;  %v5938_v40 = vld [vmem:[#allocation3 + $0x78c] ss:$24 sps:$4 sm:$0xff]  }
 0x112   :  { %2764 = vmatprep.subr.bf16.mxu1 %v5857_v41  ;;  %2751 = vmatprep.mubr.bf16.mxu0 %v6707_v45  ;;  %v5941_v41 = vld [vmem:[#allocation3 + $0xa8c] ss:$24 sps:$4 sm:$0xff]  }
 0x113   :  { %2794 = vmatprep.mubr.bf16.mxu1 %v6712_v47 }
 0x114   :  { %2722 = vmatpush1.bf16.msra.mxu0 %v5852_v42  ;;  %v5936_v42 = vld [vmem:[#allocation3 + $0x788] ss:$24 sps:$4 sm:$0xff]  }
 0x115   :  { %2765 = vmatpush1.bf16.msra.mxu1 %v5855_v43  ;;  %2723 = vmatprep.subr.bf16.mxu0 %v5860_v44  ;;  %v5939_v43 = vld [vmem:[#allocation3 + $0xa88] ss:$24 sps:$4 sm:$0xff]   ;;  %v5944_v44 = vld [vmem:[#allocation3 + $0x164] ss:$24 sps:$4 sm:$0xff]  }
 0x116   :  { %2766 = vmatprep.subr.bf16.mxu1 %v5863_v46  ;;  %v5947_v46 = vld [vmem:[#allocation3 + $0x464] ss:$24 sps:$4 sm:$0xff]  }
 0x118   :  { %2724 = vmatpush1.bf16.msra.mxu0 %v5858_v48  ;;  %v5942_v48 = vld [vmem:[#allocation3 + $0x160] ss:$24 sps:$4 sm:$0xff]  }
 0x119   :  { %2767 = vmatpush1.bf16.msra.mxu1 %v5861_v49  ;;  %2725 = vmatprep.subr.bf16.mxu0 %v5866_v50  ;;  %v5945_v49 = vld [vmem:[#allocation3 + $0x460] ss:$24 sps:$4 sm:$0xff]   ;;  %v5950_v50 = vld [vmem:[#allocation3 + $0x134] ss:$24 sps:$4 sm:$0xff]  }
 0x11a   :  { %2768 = vmatprep.subr.bf16.mxu1 %v5869_v51  ;;  %v5953_v51 = vld [vmem:[#allocation3 + $0x434] ss:$24 sps:$4 sm:$0xff]  }
 0x11c   :  { %2726 = vmatpush1.bf16.msra.mxu0 %v5864_v52  ;;  %v5948_v52 = vld [vmem:[#allocation3 + $0x130] ss:$24 sps:$4 sm:$0xff]  }
 0x11d   :  { %2769 = vmatpush1.bf16.msra.mxu1 %v5867_v55  ;;  %2727 = vmatprep.subr.bf16.mxu0 %v5872_v56  ;;  %v5951_v55 = vld [vmem:[#allocation3 + $0x430] ss:$24 sps:$4 sm:$0xff]   ;;  %v5956_v56 = vld [vmem:[#allocation3 + $0x104] ss:$24 sps:$4 sm:$0xff]  }
 0x11e   :  { %2770 = vmatprep.subr.bf16.mxu1 %v5875_v57  ;;  %v5959_v57 = vld [vmem:[#allocation3 + $0x404] ss:$24 sps:$4 sm:$0xff]  }
 0x120   :  { %2728 = vmatpush1.bf16.msra.mxu0 %v5870_v58  ;;  %v5954_v58 = vld [vmem:[#allocation3 + $0x100] ss:$24 sps:$4 sm:$0xff]  }
 0x121   :  { %2771 = vmatpush1.bf16.msra.mxu1 %v5873_v59  ;;  %2729 = vmatprep.subr.bf16.mxu0 %v5878_v60  ;;  %v5957_v59 = vld [vmem:[#allocation3 + $0x400] ss:$24 sps:$4 sm:$0xff]   ;;  %v5962_v60 = vld [vmem:[#allocation3 + $0xd4] ss:$24 sps:$4 sm:$0xff]  }
 0x122   :  { %2772 = vmatprep.subr.bf16.mxu1 %v5881_v61  ;;  %v5965_v61 = vld [vmem:[#allocation3 + $0x3d4] ss:$24 sps:$4 sm:$0xff]  }
 0x124   :  { %2730 = vmatpush1.bf16.msra.mxu0 %v5876_v62  ;;  %v5960_v62 = vld [vmem:[#allocation3 + $0xd0] ss:$24 sps:$4 sm:$0xff]  }
 0x125   :  { %2773 = vmatpush1.bf16.msra.mxu1 %v5879_v63  ;;  %2731 = vmatprep.subr.bf16.mxu0 %v5884_v0  ;;  %v5963_v63 = vld [vmem:[#allocation3 + $0x3d0] ss:$24 sps:$4 sm:$0xff]   ;;  %v5968_v0 = vld [vmem:[#allocation3 + $0xa4] ss:$24 sps:$4 sm:$0xff]  }
 0x126   :  { %2774 = vmatprep.subr.bf16.mxu1 %v5887_v1  ;;  %v5971_v1 = vld [vmem:[#allocation3 + $0x3a4] ss:$24 sps:$4 sm:$0xff]  }
 0x128   :  { %2732 = vmatpush1.bf16.msra.mxu0 %v5882_v2  ;;  %v5969_v2 = vld [vmem:[#allocation3 + $0x3a0] ss:$24 sps:$4 sm:$0xff]  }
 0x129   :  { %2775 = vmatpush1.bf16.msra.mxu1 %v5885_v3  ;;  %2733 = vmatprep.subr.bf16.mxu0 %v5890_v4  ;;  %v5977_v3 = vld [vmem:[#allocation3 + $0x374] ss:$24 sps:$4 sm:$0xff]   ;;  %v5972_v4 = vld [vmem:[#allocation3 + $0x70] ss:$24 sps:$4 sm:$0xff]  }
 0x12a   :  { %2776 = vmatprep.subr.bf16.mxu1 %v5893_v5  ;;  %v5975_v5 = vld [vmem:[#allocation3 + $0x370] ss:$24 sps:$4 sm:$0xff]  }
 0x12c   :  { %2734 = vmatpush1.bf16.msra.mxu0 %v5888_v6  ;;  %v5980_v6 = vld [vmem:[#allocation3 + $0x44] ss:$24 sps:$4 sm:$0xff]  }
 0x12d   :  { %2777 = vmatpush1.bf16.msra.mxu1 %v5891_v7  ;;  %2735 = vmatprep.subr.bf16.mxu0 %v5896_v8  ;;  %v5983_v7 = vld [vmem:[#allocation3 + $0x344] ss:$24 sps:$4 sm:$0xff]   ;;  %v5978_v8 = vld [vmem:[#allocation3 + $0x40] ss:$24 sps:$4 sm:$0xff]  }
 0x12e   :  { %2778 = vmatprep.subr.bf16.mxu1 %v5899_v9  ;;  %v5981_v9 = vld [vmem:[#allocation3 + $0x340] ss:$24 sps:$4 sm:$0xff]  }
 0x130   :  { %2736 = vmatpush2.bf16.msra.mxu0 %v5894_v10  ;;  %v5986_v10 = vld [vmem:[#allocation3 + $0x14] ss:$24 sps:$4 sm:$0xff]  }
 0x131   :  { %2779 = vmatpush2.bf16.msra.mxu1 %v5897_v11  ;;  %2737 = vmatprep.subr.bf16.mxu0 %v5902_v14  ;;  %v5989_v11 = vld [vmem:[#allocation3 + $0x314] ss:$24 sps:$4 sm:$0xff]   ;;  %v5984_v14 = vld [vmem:[#allocation3 + $0x10] ss:$24 sps:$4 sm:$0xff]  }
 0x132   :  { %2780 = vmatprep.subr.bf16.mxu1 %v5905_v15  ;;  %v5987_v15 = vld [vmem:[#allocation3 + $0x310] ss:$24 sps:$4 sm:$0xff]  }
 0x134   :  { %2738 = vmatpush2.bf16.msra.mxu0 %v5900_v16  ;;  %v5992_v16 = vld [vmem:[#allocation3 + $0x2e4] ss:$24 sps:$4 sm:$0xff]  }
 0x135   :  { %2781 = vmatpush2.bf16.msra.mxu1 %v5903_v17  ;;  %2739 = vmatprep.subr.bf16.mxu0 %v5908_v18  ;;  %v5995_v17 = vld [vmem:[#allocation3 + $0x5e4] ss:$24 sps:$4 sm:$0xff]   ;;  %v5990_v18 = vld [vmem:[#allocation3 + $0x2e0] ss:$24 sps:$4 sm:$0xff]  }
 0x136   :  { %2782 = vmatprep.subr.bf16.mxu1 %v5911_v19  ;;  %v5993_v19 = vld [vmem:[#allocation3 + $0x5e0] ss:$24 sps:$4 sm:$0xff]  }
 0x138   :  { %2740 = vmatpush2.bf16.msra.mxu0 %v5906_v20  ;;  %v5998_v20 = vld [vmem:[#allocation3 + $0x2b4] ss:$24 sps:$4 sm:$0xff]  }
 0x139   :  { %2783 = vmatpush2.bf16.msra.mxu1 %v5909_v21  ;;  %2741 = vmatprep.subr.bf16.mxu0 %v5914_v22  ;;  %v6001_v21 = vld [vmem:[#allocation3 + $0x5b4] ss:$24 sps:$4 sm:$0xff]   ;;  %v5996_v22 = vld [vmem:[#allocation3 + $0x2b0] ss:$24 sps:$4 sm:$0xff]  }
 0x13a   :  { %2784 = vmatprep.subr.bf16.mxu1 %v5917_v23  ;;  %v5999_v23 = vld [vmem:[#allocation3 + $0x5b0] ss:$24 sps:$4 sm:$0xff]  }
 0x13c   :  { %2742 = vmatpush2.bf16.msra.mxu0 %v5912_v24  ;;  %v6004_v24 = vld [vmem:[#allocation3 + $0x284] ss:$24 sps:$4 sm:$0xff]  }
 0x13d   :  { %2785 = vmatpush2.bf16.msra.mxu1 %v5915_v25  ;;  %2743 = vmatprep.subr.bf16.mxu0 %v5920_v26  ;;  %v6007_v25 = vld [vmem:[#allocation3 + $0x584] ss:$24 sps:$4 sm:$0xff]   ;;  %v6002_v26 = vld [vmem:[#allocation3 + $0x280] ss:$24 sps:$4 sm:$0xff]  }
 0x13e   :  { %2786 = vmatprep.subr.bf16.mxu1 %v5923_v27  ;;  %v6005_v27 = vld [vmem:[#allocation3 + $0x580] ss:$24 sps:$4 sm:$0xff]  }
 0x140   :  { %2744 = vmatpush2.bf16.msra.mxu0 %v5918_v30  ;;  %v6010_v30 = vld [vmem:[#allocation3 + $0x254] ss:$24 sps:$4 sm:$0xff]  }
 0x141   :  { %2787 = vmatpush2.bf16.msra.mxu1 %v5921_v31  ;;  %2745 = vmatprep.subr.bf16.mxu0 %v5926_v32  ;;  %v6013_v31 = vld [vmem:[#allocation3 + $0x554] ss:$24 sps:$4 sm:$0xff]   ;;  %v6008_v32 = vld [vmem:[#allocation3 + $0x250] ss:$24 sps:$4 sm:$0xff]  }
 0x142   :  { %2788 = vmatprep.subr.bf16.mxu1 %v5929_v33  ;;  %v6011_v33 = vld [vmem:[#allocation3 + $0x550] ss:$24 sps:$4 sm:$0xff]  }
 0x144   :  { %2746 = vmatpush2.bf16.msra.mxu0 %v5924_v34  ;;  %v6016_v34 = vld [vmem:[#allocation3 + $0x224] ss:$24 sps:$4 sm:$0xff]  }
 0x145   :  { %2789 = vmatpush2.bf16.msra.mxu1 %v5927_v35  ;;  %2747 = vmatprep.subr.bf16.mxu0 %v5932_v36  ;;  %v6019_v35 = vld [vmem:[#allocation3 + $0x524] ss:$24 sps:$4 sm:$0xff]   ;;  %v6014_v36 = vld [vmem:[#allocation3 + $0x220] ss:$24 sps:$4 sm:$0xff]  }
 0x146   :  { %2790 = vmatprep.subr.bf16.mxu1 %v5935_v37  ;;  %v6017_v37 = vld [vmem:[#allocation3 + $0x520] ss:$24 sps:$4 sm:$0xff]  }
 0x148   :  { %2748 = vmatpush2.bf16.msra.mxu0 %v5930_v38  ;;  %v6022_v38 = vld [vmem:[#allocation3 + $0x1f4] ss:$24 sps:$4 sm:$0xff]  }
 0x149   :  { %2791 = vmatpush2.bf16.msra.mxu1 %v5933_v39  ;;  %2749 = vmatprep.subr.bf16.mxu0 %v5938_v40  ;;  %v6025_v39 = vld [vmem:[#allocation3 + $0x4f4] ss:$24 sps:$4 sm:$0xff]   ;;  %v6020_v40 = vld [vmem:[#allocation3 + $0x1f0] ss:$24 sps:$4 sm:$0xff]  }
 0x14a   :  { %2792 = vmatprep.subr.bf16.mxu1 %v5941_v41  ;;  %v6023_v41 = vld [vmem:[#allocation3 + $0x4f0] ss:$24 sps:$4 sm:$0xff]  }
 0x14c   :  { %2750 = vmatpush2.bf16.msra.mxu0 %v5936_v42  ;;  %v6028_v42 = vld [vmem:[#allocation3 + $0x1c4] ss:$24 sps:$4 sm:$0xff]  }
 0x14d   :  { %2793 = vmatpush2.bf16.msra.mxu1 %v5939_v43  ;;  %2805 = vmatprep.subr.bf16.mxu0 %v5944_v44 }
 0x14e   :  { %2848 = vmatprep.subr.bf16.mxu1 %v5947_v46  ;;  %v6031_v46 = vld [vmem:[#allocation3 + $0x4c4] ss:$24 sps:$4 sm:$0xff]  }
 0x14f   :  { %2752 = vmatmul.mubr.bf16.vlgmr.msra.gmra.mxu0 %v6728_v28  ;;  %v2495_v43 = vpop.f32.mrf.mxu0 }
 0x150   :  { %2795 = vmatmul.mubr.bf16.vlgmr.msra.gmra.mxu1 %v6730_v29  ;;  %2806 = vmatpush1.bf16.msra.mxu0 %v5942_v48  ;;  %v2538_v44 = vpop.f32.mrf.mxu1  ;;  %v3018_v48 = vlaneseq }
 0x151   :  { %2849 = vmatpush1.bf16.msra.mxu1 %v5945_v49  ;;  %2807 = vmatprep.subr.bf16.mxu0 %v5950_v50  ;;  %v6026_v49 = vld [vmem:[#allocation3 + $0x1c0] ss:$24 sps:$4 sm:$0xff]  }
 0x152   :  { %2850 = vmatprep.subr.bf16.mxu1 %v5953_v51  ;;  %2837 = vmatprep.mubr.bf16.mxu0 %v6674_v53  ;;  %v5966_v53 = vld [vmem:[#allocation3 + $0xa0] ss:$24 sps:$4 sm:$0xff]   ;;  %v6034_v51 = vld [vmem:[#allocation3 + $0x194] ss:$24 sps:$4 sm:$0xff]  }
 0x153   :  { %2880 = vmatprep.mubr.bf16.mxu1 %v6676_v54  ;;  %v5974_v54 = vld [vmem:[#allocation3 + $0x74] ss:$24 sps:$4 sm:$0xff]   ;;  %v6029_v50 = vld [vmem:[#allocation3 + $0x4c0] ss:$24 sps:$4 sm:$0xff]  }
 0x154   :  { %2808 = vmatpush1.bf16.msra.mxu0 %v5948_v52  ;;  %v2497_v52 = vpop.f32.mrf.mxu0 }
 0x155   :  { %2851 = vmatpush1.bf16.msra.mxu1 %v5951_v55  ;;  %2809 = vmatprep.subr.bf16.mxu0 %v5956_v56  ;;  %v2540_v55 = vpop.f32.mrf.mxu1  ;;  %v6037_v56 = vld [vmem:[#allocation3 + $0x494] ss:$24 sps:$4 sm:$0xff]  }
 0x156   :  { %2852 = vmatprep.subr.bf16.mxu1 %v5959_v57  ;;  %v6744_v57 = vshrl.u32 %v3018_v48, 7  ;;  %v6062_v48 = vld [vmem:[#allocation3 + $0x6a0] ss:$24 sps:$4 sm:$0xff]  }
 0x158   :  { %2810 = vmatpush1.bf16.msra.mxu0 %v5954_v58  ;;  %v6032_v58 = vld [vmem:[#allocation3 + $0x190] ss:$24 sps:$4 sm:$0xff]  }
 0x159   :  { %2853 = vmatpush1.bf16.msra.mxu1 %v5957_v59  ;;  %2811 = vmatprep.subr.bf16.mxu0 %v5962_v60  ;;  %v6035_v59 = vld [vmem:[#allocation3 + $0x490] ss:$24 sps:$4 sm:$0xff]   ;;  %v6040_v60 = vld [vmem:[#allocation3 + $0x764] ss:$24 sps:$4 sm:$0xff]  }
 0x15a   :  { %2854 = vmatprep.subr.bf16.mxu1 %v5965_v61  ;;  %v2499_v61 = vpop.f32.mrf.mxu0 }
 0x15c   :  { %2812 = vmatpush1.bf16.msra.mxu0 %v5960_v62  ;;  %v2542_v62 = vpop.f32.mrf.mxu1 }
 0x15d   :  { %2855 = vmatpush1.bf16.msra.mxu1 %v5963_v63  ;;  %2813 = vmatprep.subr.bf16.mxu0 %v5968_v0  ;;  %v6043_v63 = vld [vmem:[#allocation3 + $0xa64] ss:$24 sps:$4 sm:$0xff]   ;;  %v6038_v0 = vld [vmem:[#allocation3 + $0x760] ss:$24 sps:$4 sm:$0xff]  }
 0x15e   :  { %2856 = vmatprep.subr.bf16.mxu1 %v5971_v1  ;;  %v6041_v1 = vld [vmem:[#allocation3 + $0xa60] ss:$24 sps:$4 sm:$0xff]  }
 0x160   :  { %2814 = vmatpush1.bf16.msra.mxu0 %v5966_v53  ;;  %v6746_v53 = vld [vmem:[#allocation5] sm:$0x3f] }
 0x161   :  { %2857 = vmatpush1.bf16.msra.mxu1 %v5969_v2  ;;  %2815 = vmatprep.subr.bf16.mxu0 %v5974_v54  ;;  %v3020_v2 = vsub.s32 0, %v6744_v57  ;;  %v6046_v54 = vld [vmem:[#allocation3 + $0x734] ss:$24 sps:$4 sm:$0xff]  }
 0x162   :  { %2858 = vmatprep.subr.bf16.mxu1 %v5977_v3  ;;  %v6049_v3 = vld [vmem:[#allocation3 + $0xa34] ss:$24 sps:$4 sm:$0xff]  }
 0x164   :  { %2816 = vmatpush1.bf16.msra.mxu0 %v5972_v4  ;;  %v2501_v4 = vpop.f32.mrf.mxu0 }
 0x165   :  { %2859 = vmatpush1.bf16.msra.mxu1 %v5975_v5  ;;  %2817 = vmatprep.subr.bf16.mxu0 %v5980_v6  ;;  %v2544_v5 = vpop.f32.mrf.mxu1  ;;  %v3024_v6 = vsub.s32 1, %v6744_v57 }
 0x166   :  { %2860 = vmatprep.subr.bf16.mxu1 %v5983_v7  ;;  %v2539_v7 = vadd.f32 %v2538_v44, %v2495_v43  ;;  %v6067_v43 = vld [vmem:[#allocation3 + $0x9a4] ss:$24 sps:$4 sm:$0xff]  }
 0x168   :  { %2818 = vmatpush1.bf16.msra.mxu0 %v5978_v8  ;;  %v6044_v8 = vld [vmem:[#allocation3 + $0x730] ss:$24 sps:$4 sm:$0xff]  }
 0x169   :  { %2861 = vmatpush1.bf16.msra.mxu1 %v5981_v9  ;;  %2819 = vmatprep.subr.bf16.mxu0 %v5986_v10  ;;  %v6047_v9 = vld [vmem:[#allocation3 + $0xa30] ss:$24 sps:$4 sm:$0xff]  }
 0x16a   :  { %2862 = vmatprep.subr.bf16.mxu1 %v5989_v11 }
 0x16c   :  { %2820 = vmatpush1.bf16.msra.mxu0 %v5984_v14  ;;  %v2541_v14 = vadd.f32 %v2540_v55, %v2497_v52  ;;  %v6068_v52 = vld [vmem:[#allocation3 + $0x670] ss:$24 sps:$4 sm:$0xff]  }
 0x16d   :  { %2863 = vmatpush1.bf16.msra.mxu1 %v5987_v15  ;;  %2821 = vmatprep.subr.bf16.mxu0 %v5992_v16  ;;  %v3021_v16 = vrot.slane %v6746_v53, %v3020_v2  ;;  %v6071_v55 = vld [vmem:[#allocation3 + $0x970] ss:$24 sps:$4 sm:$0xff]  }
 0x16e   :  { %2864 = vmatprep.subr.bf16.mxu1 %v5995_v17  ;;  %v6052_v17 = vld [vmem:[#allocation3 + $0x704] ss:$24 sps:$4 sm:$0xff]  }
 0x170   :  { %2822 = vmatpush2.bf16.msra.mxu0 %v5990_v18 }
 0x171   :  { %2865 = vmatpush2.bf16.msra.mxu1 %v5993_v19  ;;  %2823 = vmatprep.subr.bf16.mxu0 %v5998_v20  ;;  %v3025_v20 = vrot.slane %v6746_v53, %v3024_v6 }
 0x172   :  { %2866 = vmatprep.subr.bf16.mxu1 %v6001_v21  ;;  %v2543_v21 = vadd.f32 %v2542_v62, %v2499_v61  ;;  %v6082_v61 = vld [vmem:[#allocation3 + $0x614] ss:$24 sps:$4 sm:$0xff]  }
 0x173   :  { %v6085_v62 = vld [vmem:[#allocation3 + $0x914] ss:$24 sps:$4 sm:$0xff]  }
 0x174   :  { %2824 = vmatpush2.bf16.msra.mxu0 %v5996_v22 }
 0x175   :  { %2867 = vmatpush2.bf16.msra.mxu1 %v5999_v23  ;;  %2825 = vmatprep.subr.bf16.mxu0 %v6004_v24  ;;  %v6050_v23 = vld [vmem:[#allocation3 + $0x700] ss:$24 sps:$4 sm:$0xff]  }
 0x176   :  { %2868 = vmatprep.subr.bf16.mxu1 %v6007_v25  ;;  %v6053_v24 = vld [vmem:[#allocation3 + $0xa00] ss:$24 sps:$4 sm:$0xff]   ;;  %v2545_v25 = vadd.f32 %v2544_v5, %v2501_v4  ;;  %v6094_v5 = vld [vmem:[#allocation3 + $0x8b4] ss:$24 sps:$4 sm:$0xff]  }
 0x177   :  { %v6089_v4 = vld [vmem:[#allocation3 + $0xbe0] ss:$24 sps:$4 sm:$0xff]  }
 0x178   :  { %2826 = vmatpush2.bf16.msra.mxu0 %v6002_v26 }
 0x179   :  { %2869 = vmatpush2.bf16.msra.mxu1 %v6005_v27  ;;  %2827 = vmatprep.subr.bf16.mxu0 %v6010_v30 }
 0x17a   :  { %2870 = vmatprep.subr.bf16.mxu1 %v6013_v31 }
 0x17c   :  { %2828 = vmatpush2.bf16.msra.mxu0 %v6008_v32 }
 0x17d   :  { %2871 = vmatpush2.bf16.msra.mxu1 %v6011_v33  ;;  %2829 = vmatprep.subr.bf16.mxu0 %v6016_v34  ;;  %v6058_v33 = vld [vmem:[#allocation3 + $0x6d4] ss:$24 sps:$4 sm:$0xff]  }
 0x17e   :  { %2872 = vmatprep.subr.bf16.mxu1 %v6019_v35  ;;  %v6061_v35 = vld [vmem:[#allocation3 + $0x9d4] ss:$24 sps:$4 sm:$0xff]  }
 0x180   :  { %2830 = vmatpush2.bf16.msra.mxu0 %v6014_v36 }
 0x181   :  { %2873 = vmatpush2.bf16.msra.mxu1 %v6017_v37  ;;  %2831 = vmatprep.subr.bf16.mxu0 %v6022_v38  ;;  %v6056_v37 = vld [vmem:[#allocation3 + $0x6d0] ss:$24 sps:$4 sm:$0xff]  }
 0x182   :  { %2874 = vmatprep.subr.bf16.mxu1 %v6025_v39  ;;  %v6059_v38 = vld [vmem:[#allocation3 + $0x9d0] ss:$24 sps:$4 sm:$0xff]  }
 0x184   :  { %2832 = vmatpush2.bf16.msra.mxu0 %v6020_v40 }
 0x185   :  { %2875 = vmatpush2.bf16.msra.mxu1 %v6023_v41  ;;  %2833 = vmatprep.subr.bf16.mxu0 %v6028_v42  ;;  %v6064_v42 = vld [vmem:[#allocation3 + $0x6a4] ss:$24 sps:$4 sm:$0xff]  }
 0x186   :  { %2876 = vmatprep.subr.bf16.mxu1 %v6031_v46 }
 0x188   :  { %2834 = vmatpush2.bf16.msra.mxu0 %v6026_v49  ;;  %v6065_v49 = vld [vmem:[#allocation3 + $0x9a0] ss:$24 sps:$4 sm:$0xff]  }
 0x189   :  { %2877 = vmatpush2.bf16.msra.mxu1 %v6029_v50  ;;  %2835 = vmatprep.subr.bf16.mxu0 %v6034_v51  ;;  %v6070_v50 = vld [vmem:[#allocation3 + $0x674] ss:$24 sps:$4 sm:$0xff]  }
 0x18a   :  { %2878 = vmatprep.subr.bf16.mxu1 %v6037_v56  ;;  %v6073_v51 = vld [vmem:[#allocation3 + $0x974] ss:$24 sps:$4 sm:$0xff]   ;;  %v6076_v56 = vld [vmem:[#allocation3 + $0x644] ss:$24 sps:$4 sm:$0xff]  }
 0x18c   :  { %2836 = vmatpush2.bf16.msra.mxu0 %v6032_v58  ;;  %v6079_v58 = vld [vmem:[#allocation3 + $0x944] ss:$24 sps:$4 sm:$0xff]  }
 0x18d   :  { %2879 = vmatpush2.bf16.msra.mxu1 %v6035_v59  ;;  %2891 = vmatprep.subr.bf16.mxu0 %v6040_v60  ;;  %v6074_v59 = vld [vmem:[#allocation3 + $0x640] ss:$24 sps:$4 sm:$0xff]  }
 0x18e   :  { %2934 = vmatprep.subr.bf16.mxu1 %v6043_v63  ;;  %v6077_v60 = vld [vmem:[#allocation3 + $0x940] ss:$24 sps:$4 sm:$0xff]   ;;  %v6080_v63 = vld [vmem:[#allocation3 + $0x610] ss:$24 sps:$4 sm:$0xff]  }
 0x18f   :  { %v2581_v10 = vpop.f32.mrf.mxu0  ;;  %2838 = vmatmul.mubr.bf16.vlgmr.msra.gmra.mxu0 %v6692_v12  ;;  %v6055_v12 = vld [vmem:[#allocation3 + $0xa04] ss:$24 sps:$4 sm:$0xff]  }
 0x190   :  { %v2624_v11 = vpop.f32.mrf.mxu1  ;;  %2881 = vmatmul.mubr.bf16.vlgmr.msra.gmra.mxu1 %v6694_v13  ;;  %v2582_v15 = vadd.f32 %v2581_v10, %v2539_v7  ;;  %2892 = vmatpush1.bf16.msra.mxu0 %v6038_v0  ;;  %v6083_v0 = vld [vmem:[#allocation3 + $0x910] ss:$24 sps:$4 sm:$0xff]   ;;  %v6097_v7 = vld [vmem:[#allocation3 + $0xbb4] ss:$24 sps:$4 sm:$0xff]   ;;  %v6100_v10 = vld [vmem:[#allocation3 + $0x884] ss:$24 sps:$4 sm:$0xff]  }
 0x191   :  { %2935 = vmatpush1.bf16.msra.mxu1 %v6041_v1  ;;  %v2583_v18 = vpop.f32.mrf.mxu0  ;;  %2893 = vmatprep.subr.bf16.mxu0 %v6046_v54  ;;  %v6088_v1 = vld [vmem:[#allocation3 + $0x8e4] ss:$24 sps:$4 sm:$0xff]  }
 0x192   :  { %v2626_v19 = vpop.f32.mrf.mxu1  ;;  %2936 = vmatprep.subr.bf16.mxu1 %v6049_v3  ;;  %v2625_v13 = vadd.f32 %v2624_v11, %v2582_v15  ;;  %v2584_v22 = vadd.f32 %v2583_v18, %v2541_v14  ;;  %2923 = vmatprep.mubr.bf16.mxu0 %v6707_v45  ;;  %v6091_v54 = vld [vmem:[#allocation3 + $0xbe4] ss:$24 sps:$4 sm:$0xff]   ;;  %v6086_v3 = vld [vmem:[#allocation3 + $0x8e0] ss:$24 sps:$4 sm:$0xff]   ;;  %v6104_v18 = vld [vmem:[#allocation3 + $0x850] ss:$24 sps:$4 sm:$0xff]  }
 0x193   :  { %2966 = vmatprep.mubr.bf16.mxu1 %v6712_v47  ;;  %v2585_v26 = vpop.f32.mrf.mxu0  ;;  %v6103_v11 = vld [vmem:[#allocation3 + $0xb84] ss:$24 sps:$4 sm:$0xff]   ;;  %v6098_v14 = vld [vmem:[#allocation3 + $0x880] ss:$24 sps:$4 sm:$0xff]  }
 0x194   :  { %v2628_v27 = vpop.f32.mrf.mxu1  ;;  %v3048_v30 = vadd.f32 %v3021_v16, %v2625_v13  ;;  %v2627_v31 = vadd.f32 %v2626_v19, %v2584_v22  ;;  %v2586_v32 = vadd.f32 %v2585_v26, %v2543_v21  ;;  %2894 = vmatpush1.bf16.msra.mxu0 %v6044_v8  ;;  %v6092_v8 = vld [vmem:[#allocation3 + $0x8b0] ss:$24 sps:$4 sm:$0xff]   ;;  %v6101_v15 = vld [vmem:[#allocation3 + $0xb80] ss:$24 sps:$4 sm:$0xff]   ;;  %v6118_v22 = vld [vmem:[#allocation3 + $0x7f4] ss:$24 sps:$4 sm:$0xff]  }
 0x195   :  { %2937 = vmatpush1.bf16.msra.mxu1 %v6047_v9  ;;  %v2587_v34 = vpop.f32.mrf.mxu0  ;;  %2895 = vmatprep.subr.bf16.mxu0 %v6052_v17  ;;  %v6095_v9 = vld [vmem:[#allocation3 + $0xbb0] ss:$24 sps:$4 sm:$0xff]   ;;  %v6109_v17 = vld [vmem:[#allocation3 + $0xb54] ss:$24 sps:$4 sm:$0xff]   ;;  %v6110_v21 = vld [vmem:[#allocation3 + $0x820] ss:$24 sps:$4 sm:$0xff]  }
 0x196   :  { %2938 = vmatprep.subr.bf16.mxu1 %v6055_v12  ;;  %3060 = vst [vmem:[%s6853_s7] sm:$0xff] %v3048_v30  ;;  %v6763_v45 = vadd.f32 %v3025_v20, %v2627_v31  ;;  %v2629_v47 = vadd.f32 %v2628_v27, %v2586_v32  ;;  %v2588_v36 = vadd.f32 %v2587_v34, %v2545_v25  ;;  %v2630_v39 = vpop.f32.mrf.mxu1  ;;  %v6107_v19 = vld [vmem:[#allocation3 + $0xb50] ss:$24 sps:$4 sm:$0xff]   ;;  %v6115_v12 = vld [vmem:[#allocation3 + $0xb24] ss:$24 sps:$4 sm:$0xff]   ;;  %v6113_v13 = vld [vmem:[#allocation3 + $0xb20] ss:$24 sps:$4 sm:$0xff]  }
 0x197   :  { %v6119_v25 = vld [vmem:[#allocation3 + $0xaf0] ss:$24 sps:$4 sm:$0xff]   ;;  %v6124_v26 = vld [vmem:[#allocation3 + $0x7c4] ss:$24 sps:$4 sm:$0xff]   ;;  %v6125_v31 = vld [vmem:[#allocation3 + $0xac0] ss:$24 sps:$4 sm:$0xff]  }
 0x198   :  { %3061 = vst [vmem:[%s6853_s7 + $0x8] sm:$0xff] %v6763_v45  ;;  %v3054_v40 = vadd.f32 %v3021_v16, %v2629_v47  ;;  %v2631_v41 = vadd.f32 %v2630_v39, %v2588_v36  ;;  %2896 = vmatpush1.bf16.msra.mxu0 %v6050_v23  ;;  %v6106_v16 = vld [vmem:[#allocation3 + $0x854] ss:$24 sps:$4 sm:$0xff]   ;;  %v6127_v27 = vld [vmem:[#allocation3 + $0xac4] ss:$24 sps:$4 sm:$0xff]  }
 0x199   :  { %2939 = vmatpush1.bf16.msra.mxu1 %v6053_v24  ;;  %2897 = vmatprep.subr.bf16.mxu0 %v6058_v33  ;;  %v6121_v23 = vld [vmem:[#allocation3 + $0xaf4] ss:$24 sps:$4 sm:$0xff]   ;;  %v6116_v24 = vld [vmem:[#allocation3 + $0x7f0] ss:$24 sps:$4 sm:$0xff]  }
 0x19a   :  { %2940 = vmatprep.subr.bf16.mxu1 %v6061_v35  ;;  %3066 = vst [vmem:[%s6853_s7 + $0x30] sm:$0xff] %v3054_v40  ;;  %v6772_v44 = vpack.c.bf16 %v3054_v40, %v3048_v30  ;;  %v6774_v46 = vadd.f32 %v3025_v20, %v2631_v41  ;;  %v6112_v20 = vld [vmem:[#allocation3 + $0x824] ss:$24 sps:$4 sm:$0xff]   ;;  %v6122_v30 = vld [vmem:[#allocation3 + $0x7c0] ss:$24 sps:$4 sm:$0xff]  }
 0x19b   :  { %v6130_v32 = vld [vmem:[#allocation3 + $0x794] ss:$24 sps:$4 sm:$0xff]   ;;  %v6128_v34 = vld [vmem:[#allocation3 + $0x790] ss:$24 sps:$4 sm:$0xff]  }
 0x19c   :  { %3067 = vst [vmem:[%s6853_s7 + $0x38] sm:$0xff] %v6774_v46  ;;  %2898 = vmatpush1.bf16.msra.mxu0 %v6056_v37  ;;  %v6133_v33 = vld [vmem:[#allocation3 + $0xa94] ss:$24 sps:$4 sm:$0xff]   ;;  %v6131_v35 = vld [vmem:[#allocation3 + $0xa90] ss:$24 sps:$4 sm:$0xff]   ;;  %v6782_v40 = vpack.c.bf16 %v6774_v46, %v6763_v45 }
 0x19d   :  { %2941 = vmatpush1.bf16.msra.mxu1 %v6059_v38  ;;  %2899 = vmatprep.subr.bf16.mxu0 %v6064_v42  ;;  %v6136_v47 = vld [vmem:[#allocation7 + $0xe4] ss:$16 sps:$4 sm:$0xff]   ;;  %v6134_v37 = vld [vmem:[#allocation7 + $0xe0] ss:$16 sps:$4 sm:$0xff]  }
 0x19e   :  { %2942 = vmatprep.subr.bf16.mxu1 %v6067_v43  ;;  %v6148_v36 = vld [vmem:[#allocation7 + $0x2e4] ss:$16 sps:$4 sm:$0xff]   ;;  %v6146_v39 = vld [vmem:[#allocation7 + $0x2e0] ss:$16 sps:$4 sm:$0xff]  }
 0x19f   :  { %v6139_v38 = vld [vmem:[#allocation7 + $0xc4] ss:$16 sps:$4 sm:$0xff]   ;;  %v6137_v42 = vld [vmem:[#allocation7 + $0xc0] ss:$16 sps:$4 sm:$0xff]  }
 0x1a0   :  { %2900 = vmatpush1.bf16.msra.mxu0 %v6062_v48  ;;  %v6154_v41 = vld [vmem:[#allocation7 + $0x2c4] ss:$16 sps:$4 sm:$0xff]   ;;  %v6152_v48 = vld [vmem:[#allocation7 + $0x2c0] ss:$16 sps:$4 sm:$0xff]  }
 0x1a1   :  { %2943 = vmatpush1.bf16.msra.mxu1 %v6065_v49  ;;  %2901 = vmatprep.subr.bf16.mxu0 %v6070_v50  ;;  %v6142_v43 = vld [vmem:[#allocation7 + $0xa4] ss:$16 sps:$4 sm:$0xff]   ;;  %v6140_v50 = vld [vmem:[#allocation7 + $0xa0] ss:$16 sps:$4 sm:$0xff]  }
 0x1a2   :  { %2944 = vmatprep.subr.bf16.mxu1 %v6073_v51  ;;  %v6160_v49 = vld [vmem:[#allocation7 + $0x2a4] ss:$16 sps:$4 sm:$0xff]   ;;  %v6158_v46 = vld [vmem:[#allocation7 + $0x2a0] ss:$16 sps:$4 sm:$0xff]  }
 0x1a3   :  { %v6145_v45 = vld [vmem:[#allocation7 + $0x84] ss:$16 sps:$4 sm:$0xff]  }
 0x1a4   :  { %2902 = vmatpush1.bf16.msra.mxu0 %v6068_v52  ;;  %v6151_v51 = vld [vmem:[#allocation7 + $0x64] ss:$16 sps:$4 sm:$0xff]   ;;  %v6164_v52 = vld [vmem:[#allocation7 + $0x280] ss:$16 sps:$4 sm:$0xff]  }
 0x1a5   :  { %2945 = vmatpush1.bf16.msra.mxu1 %v6071_v55  ;;  %2903 = vmatprep.subr.bf16.mxu0 %v6076_v56  ;;  %v6172_v55 = vld [vmem:[#allocation7 + $0x264] ss:$16 sps:$4 sm:$0xff]   ;;  %v6149_v56 = vld [vmem:[#allocation7 + $0x60] ss:$16 sps:$4 sm:$0xff]  }
 0x1a6   :  { %2946 = vmatprep.subr.bf16.mxu1 %v6079_v58  ;;  %v6157_v58 = vld [vmem:[#allocation7 + $0x44] ss:$16 sps:$4 sm:$0xff]  }
 0x1a8   :  { %2904 = vmatpush1.bf16.msra.mxu0 %v6074_v59  ;;  %v6170_v59 = vld [vmem:[#allocation7 + $0x260] ss:$16 sps:$4 sm:$0xff]  }
 0x1a9   :  { %2947 = vmatpush1.bf16.msra.mxu1 %v6077_v60  ;;  %2905 = vmatprep.subr.bf16.mxu0 %v6082_v61  ;;  %v6178_v60 = vld [vmem:[#allocation7 + $0x244] ss:$16 sps:$4 sm:$0xff]   ;;  %v6155_v61 = vld [vmem:[#allocation7 + $0x40] ss:$16 sps:$4 sm:$0xff]  }
 0x1aa   :  { %2948 = vmatprep.subr.bf16.mxu1 %v6085_v62  ;;  %v6163_v62 = vld [vmem:[#allocation7 + $0x24] ss:$16 sps:$4 sm:$0xff]  }
 0x1ac   :  { %2906 = vmatpush1.bf16.msra.mxu0 %v6080_v63  ;;  %v6176_v63 = vld [vmem:[#allocation7 + $0x240] ss:$16 sps:$4 sm:$0xff]  }
 0x1ad   :  { %2949 = vmatpush1.bf16.msra.mxu1 %v6083_v0  ;;  %2907 = vmatprep.subr.bf16.mxu0 %v6088_v1  ;;  %v6184_v0 = vld [vmem:[#allocation7 + $0x224] ss:$16 sps:$4 sm:$0xff]   ;;  %v6161_v1 = vld [vmem:[#allocation7 + $0x20] ss:$16 sps:$4 sm:$0xff]  }
 0x1ae   :  { %2950 = vmatprep.subr.bf16.mxu1 %v6091_v54  ;;  %v6169_v54 = vld [vmem:[#allocation7 + $0x4] ss:$16 sps:$4 sm:$0xff]  }
 0x1b0   :  { %2908 = vmatpush2.bf16.msra.mxu0 %v6086_v3  ;;  %v6182_v3 = vld [vmem:[#allocation7 + $0x220] ss:$16 sps:$4 sm:$0xff]  }
 0x1b1   :  { %2951 = vmatpush2.bf16.msra.mxu1 %v6089_v4  ;;  %2909 = vmatprep.subr.bf16.mxu0 %v6094_v5  ;;  %v6190_v4 = vld [vmem:[#allocation7 + $0x204] ss:$16 sps:$4 sm:$0xff]   ;;  %v6167_v5 = vld [vmem:[#allocation7] ss:$16 sps:$4 sm:$0xff]  }
 0x1b2   :  { %2952 = vmatprep.subr.bf16.mxu1 %v6097_v7  ;;  %v6175_v7 = vld [vmem:[#allocation7 + $0x1e4] ss:$16 sps:$4 sm:$0xff]  }
 0x1b4   :  { %2910 = vmatpush2.bf16.msra.mxu0 %v6092_v8  ;;  %v6188_v8 = vld [vmem:[#allocation7 + $0x200] ss:$16 sps:$4 sm:$0xff]  }
 0x1b5   :  { %2953 = vmatpush2.bf16.msra.mxu1 %v6095_v9  ;;  %2911 = vmatprep.subr.bf16.mxu0 %v6100_v10  ;;  %v6196_v9 = vld [vmem:[#allocation7 + $0x3e4] ss:$16 sps:$4 sm:$0xff]   ;;  %v6173_v10 = vld [vmem:[#allocation7 + $0x1e0] ss:$16 sps:$4 sm:$0xff]  }
 0x1b6   :  { %2954 = vmatprep.subr.bf16.mxu1 %v6103_v11  ;;  %v6181_v11 = vld [vmem:[#allocation7 + $0x1c4] ss:$16 sps:$4 sm:$0xff]  }
 0x1b8   :  { %2912 = vmatpush2.bf16.msra.mxu0 %v6098_v14  ;;  %v6194_v14 = vld [vmem:[#allocation7 + $0x3e0] ss:$16 sps:$4 sm:$0xff]  }
 0x1b9   :  { %2955 = vmatpush2.bf16.msra.mxu1 %v6101_v15  ;;  %2913 = vmatprep.subr.bf16.mxu0 %v6106_v16  ;;  %v6202_v15 = vld [vmem:[#allocation7 + $0x3c4] ss:$16 sps:$4 sm:$0xff]   ;;  %v6179_v16 = vld [vmem:[#allocation7 + $0x1c0] ss:$16 sps:$4 sm:$0xff]  }
 0x1ba   :  { %2956 = vmatprep.subr.bf16.mxu1 %v6109_v17  ;;  %v6187_v17 = vld [vmem:[#allocation7 + $0x1a4] ss:$16 sps:$4 sm:$0xff]  }
 0x1bc   :  { %2914 = vmatpush2.bf16.msra.mxu0 %v6104_v18  ;;  %v6200_v18 = vld [vmem:[#allocation7 + $0x3c0] ss:$16 sps:$4 sm:$0xff]  }
 0x1bd   :  { %2957 = vmatpush2.bf16.msra.mxu1 %v6107_v19  ;;  %2915 = vmatprep.subr.bf16.mxu0 %v6112_v20  ;;  %v6208_v19 = vld [vmem:[#allocation7 + $0x3a4] ss:$16 sps:$4 sm:$0xff]   ;;  %v6185_v20 = vld [vmem:[#allocation7 + $0x1a0] ss:$16 sps:$4 sm:$0xff]  }
 0x1be   :  { %2958 = vmatprep.subr.bf16.mxu1 %v6115_v12  ;;  %v6193_v12 = vld [vmem:[#allocation7 + $0x184] ss:$16 sps:$4 sm:$0xff]  }
 0x1c0   :  { %2916 = vmatpush2.bf16.msra.mxu0 %v6110_v21  ;;  %v6206_v21 = vld [vmem:[#allocation7 + $0x3a0] ss:$16 sps:$4 sm:$0xff]  }
 0x1c1   :  { %2959 = vmatpush2.bf16.msra.mxu1 %v6113_v13  ;;  %2917 = vmatprep.subr.bf16.mxu0 %v6118_v22  ;;  %v6214_v13 = vld [vmem:[#allocation7 + $0x384] ss:$16 sps:$4 sm:$0xff]   ;;  %v6191_v22 = vld [vmem:[#allocation7 + $0x180] ss:$16 sps:$4 sm:$0xff]  }
 0x1c2   :  { %2960 = vmatprep.subr.bf16.mxu1 %v6121_v23  ;;  %v6199_v23 = vld [vmem:[#allocation7 + $0x164] ss:$16 sps:$4 sm:$0xff]  }
 0x1c4   :  { %2918 = vmatpush2.bf16.msra.mxu0 %v6116_v24  ;;  %v6212_v24 = vld [vmem:[#allocation7 + $0x380] ss:$16 sps:$4 sm:$0xff]  }
 0x1c5   :  { %2961 = vmatpush2.bf16.msra.mxu1 %v6119_v25  ;;  %2919 = vmatprep.subr.bf16.mxu0 %v6124_v26  ;;  %v6220_v25 = vld [vmem:[#allocation7 + $0x364] ss:$16 sps:$4 sm:$0xff]   ;;  %v6197_v26 = vld [vmem:[#allocation7 + $0x160] ss:$16 sps:$4 sm:$0xff]  }
 0x1c6   :  { %2962 = vmatprep.subr.bf16.mxu1 %v6127_v27  ;;  %v6205_v27 = vld [vmem:[#allocation7 + $0x144] ss:$16 sps:$4 sm:$0xff]  }
 0x1c8   :  { %2920 = vmatpush2.bf16.msra.mxu0 %v6122_v30  ;;  %v6218_v30 = vld [vmem:[#allocation7 + $0x360] ss:$16 sps:$4 sm:$0xff]  }
 0x1c9   :  { %2963 = vmatpush2.bf16.msra.mxu1 %v6125_v31  ;;  %2921 = vmatprep.subr.bf16.mxu0 %v6130_v32  ;;  %v6223_v31 = vld [vmem:[#allocation7 + $0x344] ss:$16 sps:$4 sm:$0xff]   ;;  %v6203_v32 = vld [vmem:[#allocation7 + $0x140] ss:$16 sps:$4 sm:$0xff]  }
 0x1ca   :  { %2964 = vmatprep.subr.bf16.mxu1 %v6133_v33 }
 0x1cc   :  { %2922 = vmatpush2.bf16.msra.mxu0 %v6128_v34 }
 0x1cd   :  { %2965 = vmatpush2.bf16.msra.mxu1 %v6131_v35  ;;  %4252 = vmatprep.subr.bf16.mxu0 %v6136_v47  ;;  %v6211_v35 = vld [vmem:[#allocation7 + $0x124] ss:$16 sps:$4 sm:$0xff]   ;;  %v6221_v47 = vld [vmem:[#allocation7 + $0x340] ss:$16 sps:$4 sm:$0xff]  }
 0x1ce   :  { %4295 = vmatprep.subr.bf16.mxu1 %v6148_v36  ;;  %v6226_v36 = vld [vmem:[#allocation7 + $0x324] ss:$16 sps:$4 sm:$0xff]  }
 0x1cf   :  { %2924 = vmatmul.mubr.bf16.vlgmr.msra.gmra.mxu0 %v6728_v28  ;;  %v6166_v28 = vld [vmem:[#allocation7 + $0x284] ss:$16 sps:$4 sm:$0xff]   ;;  %v2667_v33 = vpop.f32.mrf.mxu0 }
 0x1d0   :  { %2967 = vmatmul.mubr.bf16.vlgmr.msra.gmra.mxu1 %v6730_v29  ;;  %4253 = vmatpush1.bf16.msra.mxu0 %v6134_v37  ;;  %v6143_v29 = vld [vmem:[#allocation7 + $0x80] ss:$16 sps:$4 sm:$0xff]   ;;  %v2710_v34 = vpop.f32.mrf.mxu1 }
 0x1d1   :  { %4284 = vmatprep.mubr.bf16.mxu0 %v6782_v40  ;;  %4254 = vmatprep.subr.bf16.mxu0 %v6139_v38  ;;  %v6209_v37 = vld [vmem:[#allocation7 + $0x120] ss:$16 sps:$4 sm:$0xff]   ;;  %v2669_v38 = vpop.f32.mrf.mxu0 }
 0x1d2   :  { %4296 = vmatpush1.bf16.msra.mxu1 %v6146_v39  ;;  %v2712_v39 = vpop.f32.mrf.mxu1 }
 0x1d3   :  { %4297 = vmatprep.subr.bf16.mxu1 %v6154_v41  ;;  %v6217_v41 = vld [vmem:[#allocation7 + $0x104] ss:$16 sps:$4 sm:$0xff]  }
 0x1d4   :  { %4255 = vmatpush1.bf16.msra.mxu0 %v6137_v42  ;;  %v6224_v42 = vld [vmem:[#allocation7 + $0x320] ss:$16 sps:$4 sm:$0xff]  }
 0x1d5   :  { %4256 = vmatprep.subr.bf16.mxu0 %v6142_v43  ;;  %v6229_v43 = vld [vmem:[#allocation7 + $0x304] ss:$16 sps:$4 sm:$0xff]  }
 0x1d6   :  { %4298 = vmatpush1.bf16.msra.mxu1 %v6152_v48  ;;  %v6215_v48 = vld [vmem:[#allocation7 + $0x100] ss:$16 sps:$4 sm:$0xff]  }
 0x1d7   :  { %4299 = vmatprep.subr.bf16.mxu1 %v6160_v49  ;;  %v2671_v49 = vpop.f32.mrf.mxu0 }
 0x1d8   :  { %4257 = vmatpush1.bf16.msra.mxu0 %v6140_v50  ;;  %v2714_v50 = vpop.f32.mrf.mxu1 }
 0x1d9   :  { %4258 = vmatprep.subr.bf16.mxu0 %v6145_v45  ;;  %v6227_v45 = vld [vmem:[#allocation7 + $0x300] ss:$16 sps:$4 sm:$0xff]  }
 0x1da   :  { %4300 = vmatpush1.bf16.msra.mxu1 %v6158_v46  ;;  %v6280_v46 = vld [vmem:[#allocation7 + $0x4e4] ss:$16 sps:$4 sm:$0xff]  }
 0x1db   :  { %4301 = vmatprep.subr.bf16.mxu1 %v6166_v28  ;;  %v6232_v28 = vld [vmem:[#allocation7 + $0xec] ss:$16 sps:$4 sm:$0xff]  }
 0x1dc   :  { %4259 = vmatpush1.bf16.msra.mxu0 %v6143_v29  ;;  %v3028_v29 = vsub.s32 2, %v6744_v57 }
 0x1dd   :  { %4260 = vmatprep.subr.bf16.mxu0 %v6151_v51  ;;  %v6278_v51 = vld [vmem:[#allocation7 + $0x4e0] ss:$16 sps:$4 sm:$0xff]  }
 0x1de   :  { %4302 = vmatpush1.bf16.msra.mxu1 %v6164_v52  ;;  %v2673_v52 = vpop.f32.mrf.mxu0 }
 0x1df   :  { %4303 = vmatprep.subr.bf16.mxu1 %v6172_v55  ;;  %v2716_v55 = vpop.f32.mrf.mxu1 }
 0x1e0   :  { %4261 = vmatpush1.bf16.msra.mxu0 %v6149_v56  ;;  %v6286_v56 = vld [vmem:[#allocation7 + $0x4c4] ss:$16 sps:$4 sm:$0xff]  }
 0x1e1   :  { %4262 = vmatprep.subr.bf16.mxu0 %v6157_v58  ;;  %v2711_v58 = vadd.f32 %v2710_v34, %v2667_v33  ;;  %v6302_v33 = vld [vmem:[#allocation7 + $0x460] ss:$16 sps:$4 sm:$0xff]   ;;  %v6310_v34 = vld [vmem:[#allocation7 + $0x444] ss:$16 sps:$4 sm:$0xff]  }
 0x1e2   :  { %4304 = vmatpush1.bf16.msra.mxu1 %v6170_v59  ;;  %v3032_v59 = vsub.s32 3, %v6744_v57 }
 0x1e3   :  { %4305 = vmatprep.subr.bf16.mxu1 %v6178_v60 }
 0x1e4   :  { %4263 = vmatpush1.bf16.msra.mxu0 %v6155_v61 }
 0x1e5   :  { %4264 = vmatprep.subr.bf16.mxu0 %v6163_v62  ;;  %v2713_v62 = vadd.f32 %v2712_v39, %v2669_v38  ;;  %v6236_v38 = vld [vmem:[#allocation7 + $0xa8] ss:$16 sps:$4 sm:$0xff]   ;;  %v6241_v39 = vld [vmem:[#allocation7 + $0x8c] ss:$16 sps:$4 sm:$0xff]  }
 0x1e6   :  { %4306 = vmatpush1.bf16.msra.mxu1 %v6176_v63 }
 0x1e7   :  { %4307 = vmatprep.subr.bf16.mxu1 %v6184_v0  ;;  %v3029_v0 = vrot.slane %v6746_v53, %v3028_v29 }
 0x1e8   :  { %4265 = vmatpush1.bf16.msra.mxu0 %v6161_v1  ;;  %v6284_v1 = vld [vmem:[#allocation7 + $0x4c0] ss:$16 sps:$4 sm:$0xff]  }
 0x1e9   :  { %4266 = vmatprep.subr.bf16.mxu0 %v6169_v54 }
 0x1ea   :  { %4308 = vmatpush1.bf16.msra.mxu1 %v6182_v3 }
 0x1eb   :  { %4309 = vmatprep.subr.bf16.mxu1 %v6190_v4  ;;  %v6292_v4 = vld [vmem:[#allocation7 + $0x4a4] ss:$16 sps:$4 sm:$0xff]  }
 0x1ec   :  { %4267 = vmatpush1.bf16.msra.mxu0 %v6167_v5  ;;  %v2715_v5 = vadd.f32 %v2714_v50, %v2671_v49  ;;  %v6328_v49 = vld [vmem:[#allocation7 + $0x5e4] ss:$16 sps:$4 sm:$0xff]   ;;  %v6242_v50 = vld [vmem:[#allocation7 + $0x68] ss:$16 sps:$4 sm:$0xff]  }
 0x1ed   :  { %4268 = vmatprep.subr.bf16.mxu0 %v6175_v7 }
 0x1ee   :  { %4310 = vmatpush1.bf16.msra.mxu1 %v6188_v8 }
 0x1ef   :  { %4311 = vmatprep.subr.bf16.mxu1 %v6196_v9  ;;  %v3033_v9 = vrot.slane %v6746_v53, %v3032_v59 }
 0x1f0   :  { %4269 = vmatpush2.bf16.msra.mxu0 %v6173_v10 }
 0x1f1   :  { %4270 = vmatprep.subr.bf16.mxu0 %v6181_v11 }
 0x1f2   :  { %4312 = vmatpush2.bf16.msra.mxu1 %v6194_v14  ;;  %v2717_v14 = vadd.f32 %v2716_v55, %v2673_v52  ;;  %v6250_v52 = vld [vmem:[#allocation7 + $0x2c] ss:$16 sps:$4 sm:$0xff]   ;;  %v6332_v55 = vld [vmem:[#allocation7 + $0x5c0] ss:$16 sps:$4 sm:$0xff]  }
 0x1f3   :  { %4313 = vmatprep.subr.bf16.mxu1 %v6202_v15 }
 0x1f4   :  { %4271 = vmatpush2.bf16.msra.mxu0 %v6179_v16 }
 0x1f5   :  { %4272 = vmatprep.subr.bf16.mxu0 %v6187_v17 }
 0x1f6   :  { %4314 = vmatpush2.bf16.msra.mxu1 %v6200_v18  ;;  %v6290_v18 = vld [vmem:[#allocation7 + $0x4a0] ss:$16 sps:$4 sm:$0xff]  }
 0x1f7   :  { %4315 = vmatprep.subr.bf16.mxu1 %v6208_v19 }
 0x1f8   :  { %4273 = vmatpush2.bf16.msra.mxu0 %v6185_v20  ;;  %v6298_v20 = vld [vmem:[#allocation7 + $0x484] ss:$16 sps:$4 sm:$0xff]  }
 0x1f9   :  { %4274 = vmatprep.subr.bf16.mxu0 %v6193_v12 }
 0x1fa   :  { %4316 = vmatpush2.bf16.msra.mxu1 %v6206_v21 }
 0x1fb   :  { %4317 = vmatprep.subr.bf16.mxu1 %v6214_v13 }
 0x1fc   :  { %4275 = vmatpush2.bf16.msra.mxu0 %v6191_v22 }
 0x1fd   :  { %4276 = vmatprep.subr.bf16.mxu0 %v6199_v23 }
 0x1fe   :  { %4318 = vmatpush2.bf16.msra.mxu1 %v6212_v24  ;;  %v6296_v24 = vld [vmem:[#allocation7 + $0x480] ss:$16 sps:$4 sm:$0xff]  }
 0x1ff   :  { %4319 = vmatprep.subr.bf16.mxu1 %v6220_v25  ;;  %v6304_v25 = vld [vmem:[#allocation7 + $0x464] ss:$16 sps:$4 sm:$0xff]  }
 0x200   :  { %4277 = vmatpush2.bf16.msra.mxu0 %v6197_v26 }
 0x201   :  { %4278 = vmatprep.subr.bf16.mxu0 %v6205_v27 }
 0x202   :  { %4320 = vmatpush2.bf16.msra.mxu1 %v6218_v30  ;;  %v6230_v30 = vld [vmem:[#allocation7 + $0xe8] ss:$16 sps:$4 sm:$0xff]  }
 0x203   :  { %4321 = vmatprep.subr.bf16.mxu1 %v6223_v31 }
 0x204   :  { %4279 = vmatpush2.bf16.msra.mxu0 %v6203_v32  ;;  %v6235_v32 = vld [vmem:[#allocation7 + $0xcc] ss:$16 sps:$4 sm:$0xff]  }
 0x205   :  { %4280 = vmatprep.subr.bf16.mxu0 %v6211_v35  ;;  %v6233_v35 = vld [vmem:[#allocation7 + $0xc8] ss:$16 sps:$4 sm:$0xff]  }
 0x206   :  { %4322 = vmatpush2.bf16.msra.mxu1 %v6221_v47  ;;  %v6238_v47 = vld [vmem:[#allocation7 + $0xac] ss:$16 sps:$4 sm:$0xff]  }
 0x207   :  { %4323 = vmatprep.subr.bf16.mxu1 %v6226_v36  ;;  %v6308_v36 = vld [vmem:[#allocation7 + $0x440] ss:$16 sps:$4 sm:$0xff]  }
 0x208   :  { %4281 = vmatpush2.bf16.msra.mxu0 %v6209_v37  ;;  %v6316_v37 = vld [vmem:[#allocation7 + $0x424] ss:$16 sps:$4 sm:$0xff]  }
 0x209   :  { %4282 = vmatprep.subr.bf16.mxu0 %v6217_v41  ;;  %v6314_v41 = vld [vmem:[#allocation7 + $0x420] ss:$16 sps:$4 sm:$0xff]  }
 0x20a   :  { %4324 = vmatpush2.bf16.msra.mxu1 %v6224_v42  ;;  %v6322_v42 = vld [vmem:[#allocation7 + $0x404] ss:$16 sps:$4 sm:$0xff]  }
 0x20b   :  { %4325 = vmatprep.subr.bf16.mxu1 %v6229_v43  ;;  %v6239_v43 = vld [vmem:[#allocation7 + $0x88] ss:$16 sps:$4 sm:$0xff]  }
 0x20c   :  { %4283 = vmatpush2.bf16.msra.mxu0 %v6215_v48  ;;  %v6244_v48 = vld [vmem:[#allocation7 + $0x6c] ss:$16 sps:$4 sm:$0xff]  }
 0x20d   :  { %4338 = vmatprep.subr.bf16.mxu0 %v6280_v46  ;;  %v6326_v46 = vld [vmem:[#allocation7 + $0x5e0] ss:$16 sps:$4 sm:$0xff]  }
 0x20e   :  { %4326 = vmatpush2.bf16.msra.mxu1 %v6227_v45  ;;  %v6247_v45 = vld [vmem:[#allocation7 + $0x4c] ss:$16 sps:$4 sm:$0xff]  }
 0x20f   :  { %4381 = vmatprep.subr.bf16.mxu1 %v6232_v28  ;;  %v2753_v60 = vpop.f32.mrf.mxu0  ;;  %4285 = vmatmul.mubr.bf16.vlgmr.msra.gmra.mxu0 %v6772_v44  ;;  %v6334_v28 = vld [vmem:[#allocation7 + $0x5c4] ss:$16 sps:$4 sm:$0xff]  }
 0x210   :  { %v2796_v61 = vpop.f32.mrf.mxu1  ;;  %v2754_v63 = vadd.f32 %v2753_v60, %v2711_v58  ;;  %4339 = vmatpush1.bf16.msra.mxu0 %v6278_v51  ;;  %v6245_v51 = vld [vmem:[#allocation7 + $0x48] ss:$16 sps:$4 sm:$0xff]   ;;  %v6253_v60 = vld [vmem:[#allocation7 + $0xc] ss:$16 sps:$4 sm:$0xff]  }
 0x211   :  { %v2755_v54 = vpop.f32.mrf.mxu0  ;;  %4340 = vmatprep.subr.bf16.mxu0 %v6286_v56  ;;  %v6340_v56 = vld [vmem:[#allocation7 + $0x5a4] ss:$16 sps:$4 sm:$0xff]   ;;  %v6248_v58 = vld [vmem:[#allocation7 + $0x28] ss:$16 sps:$4 sm:$0xff]  }
 0x212   :  { %v2798_v3 = vpop.f32.mrf.mxu1  ;;  %v2797_v7 = vadd.f32 %v2796_v61, %v2754_v63  ;;  %v2756_v8 = vadd.f32 %v2755_v54, %v2713_v62  ;;  %v6338_v61 = vld [vmem:[#allocation7 + $0x5a0] ss:$16 sps:$4 sm:$0xff]   ;;  %v6346_v62 = vld [vmem:[#allocation7 + $0x584] ss:$16 sps:$4 sm:$0xff]   ;;  %v6251_v63 = vld [vmem:[#allocation7 + $0x8] ss:$16 sps:$4 sm:$0xff]  }
 0x213   :  { %v2757_v10 = vpop.f32.mrf.mxu0  ;;  %v6352_v54 = vld [vmem:[#allocation7 + $0x564] ss:$16 sps:$4 sm:$0xff]  }
 0x214   :  { %v2800_v11 = vpop.f32.mrf.mxu1  ;;  %v3050_v15 = vadd.f32 %v3029_v0, %v2797_v7  ;;  %v2799_v16 = vadd.f32 %v2798_v3, %v2756_v8  ;;  %v2758_v17 = vadd.f32 %v2757_v10, %v2715_v5  ;;  %4341 = vmatpush1.bf16.msra.mxu0 %v6284_v1  ;;  %v6344_v1 = vld [vmem:[#allocation7 + $0x580] ss:$16 sps:$4 sm:$0xff]   ;;  %v6254_v3 = vld [vmem:[#allocation7 + $0x1e8] ss:$16 sps:$4 sm:$0xff]   ;;  %v6358_v7 = vld [vmem:[#allocation7 + $0x544] ss:$16 sps:$4 sm:$0xff]  }
 0x215   :  { %v2759_v19 = vpop.f32.mrf.mxu0  ;;  %4342 = vmatprep.subr.bf16.mxu0 %v6292_v4  ;;  %v6259_v4 = vld [vmem:[#allocation7 + $0x1cc] ss:$16 sps:$4 sm:$0xff]   ;;  %v6350_v5 = vld [vmem:[#allocation7 + $0x560] ss:$16 sps:$4 sm:$0xff]   ;;  %v6257_v8 = vld [vmem:[#allocation7 + $0x1c8] ss:$16 sps:$4 sm:$0xff]  }
 0x216   :  { %3062 = vst [vmem:[%s6853_s7 + $0x10] sm:$0xff] %v3050_v15  ;;  %v3051_v12 = vadd.f32 %v3033_v9, %v2799_v16  ;;  %v2801_v21 = vadd.f32 %v2800_v11, %v2758_v17  ;;  %v2760_v13 = vadd.f32 %v2759_v19, %v2717_v14  ;;  %v2802_v22 = vpop.f32.mrf.mxu1  ;;  %v6356_v10 = vld [vmem:[#allocation7 + $0x540] ss:$16 sps:$4 sm:$0xff]   ;;  %v6364_v11 = vld [vmem:[#allocation7 + $0x524] ss:$16 sps:$4 sm:$0xff]  }
 0x217   :  { %v6260_v14 = vld [vmem:[#allocation7 + $0x1a8] ss:$16 sps:$4 sm:$0xff]   ;;  %v6362_v16 = vld [vmem:[#allocation7 + $0x520] ss:$16 sps:$4 sm:$0xff]   ;;  %v6370_v17 = vld [vmem:[#allocation7 + $0x504] ss:$16 sps:$4 sm:$0xff]  }
 0x218   :  { %3063 = vst [vmem:[%s6853_s7 + $0x18] sm:$0xff] %v3051_v12  ;;  %v3056_v53 = vadd.f32 %v3029_v0, %v2801_v21  ;;  %v2803_v23 = vadd.f32 %v2802_v22, %v2760_v13  ;;  %4343 = vmatpush1.bf16.msra.mxu0 %v6290_v18  ;;  %v6256_v0 = vld [vmem:[#allocation7 + $0x1ec] ss:$16 sps:$4 sm:$0xff]   ;;  %v6263_v18 = vld [vmem:[#allocation7 + $0x188] ss:$16 sps:$4 sm:$0xff]  }
 0x219   :  { %4344 = vmatprep.subr.bf16.mxu0 %v6298_v20  ;;  %v6268_v19 = vld [vmem:[#allocation7 + $0x16c] ss:$16 sps:$4 sm:$0xff]   ;;  %v6368_v20 = vld [vmem:[#allocation7 + $0x500] ss:$16 sps:$4 sm:$0xff]   ;;  %v6266_v21 = vld [vmem:[#allocation7 + $0x168] ss:$16 sps:$4 sm:$0xff]  }
 0x21a   :  { %3068 = vst [vmem:[%s6853_s7 + $0x40] sm:$0xff] %v3056_v53  ;;  %v3057_v26 = vadd.f32 %v3033_v9, %v2803_v23  ;;  %v6810_v31 = vpack.c.bf16 %v3056_v53, %v3050_v15  ;;  %v6262_v9 = vld [vmem:[#allocation7 + $0x1ac] ss:$16 sps:$4 sm:$0xff]   ;;  %v6269_v22 = vld [vmem:[#allocation7 + $0x148] ss:$16 sps:$4 sm:$0xff]  }
 0x21b   :  { %v6265_v15 = vld [vmem:[#allocation7 + $0x18c] ss:$16 sps:$4 sm:$0xff]   ;;  %v6272_v23 = vld [vmem:[#allocation7 + $0x128] ss:$16 sps:$4 sm:$0xff]  }
 0x21c   :  { %3069 = vst [vmem:[%s6853_s7 + $0x48] sm:$0xff] %v3057_v26  ;;  %v6808_v27 = vpack.c.bf16 %v3057_v26, %v3051_v12  ;;  %4345 = vmatpush1.bf16.msra.mxu0 %v6296_v24  ;;  %v6376_v12 = vld [vmem:[#allocation7 + $0x2ec] ss:$16 sps:$4 sm:$0xff]  }
 0x21d   :  { %4346 = vmatprep.subr.bf16.mxu0 %v6304_v25  ;;  %v6271_v13 = vld [vmem:[#allocation7 + $0x14c] ss:$16 sps:$4 sm:$0xff]   ;;  %v6275_v25 = vld [vmem:[#allocation7 + $0x108] ss:$16 sps:$4 sm:$0xff]  }
 0x21e   :  { %4327 = vmatprep.mubr.bf16.mxu1 %v6808_v27  ;;  %v6274_v53 = vld [vmem:[#allocation7 + $0x12c] ss:$16 sps:$4 sm:$0xff]  }
 0x21f   :  { %4328 = vmatmul.mubr.bf16.vlgmr.msra.gmra.mxu1 %v6810_v31  ;;  %v6277_v24 = vld [vmem:[#allocation7 + $0x10c] ss:$16 sps:$4 sm:$0xff]  }
 0x220   :  { %4382 = vmatpush1.bf16.msra.mxu1 %v6230_v30  ;;  %4413 = vmatprep.mubr.bf16.mxu1 %v6782_v40  ;;  %v6320_v40 = vld [vmem:[#allocation7 + $0x400] ss:$16 sps:$4 sm:$0xff]   ;;  %v6283_v26 = vld [vmem:[#allocation7 + $0x4ec] ss:$16 sps:$4 sm:$0xff]   ;;  %v6281_v30 = vld [vmem:[#allocation7 + $0x4e8] ss:$16 sps:$4 sm:$0xff]  }
 0x221   :  { %4383 = vmatprep.subr.bf16.mxu1 %v6235_v32  ;;  %4347 = vmatpush1.bf16.msra.mxu0 %v6302_v33  ;;  %v6289_v32 = vld [vmem:[#allocation7 + $0x4cc] ss:$16 sps:$4 sm:$0xff]   ;;  %v6287_v33 = vld [vmem:[#allocation7 + $0x4c8] ss:$16 sps:$4 sm:$0xff]  }
 0x222   :  { %4348 = vmatprep.subr.bf16.mxu0 %v6310_v34  ;;  %v6295_v34 = vld [vmem:[#allocation7 + $0x4ac] ss:$16 sps:$4 sm:$0xff]  }
 0x224   :  { %4384 = vmatpush1.bf16.msra.mxu1 %v6233_v35  ;;  %v6293_v35 = vld [vmem:[#allocation7 + $0x4a8] ss:$16 sps:$4 sm:$0xff]  }
 0x225   :  { %4385 = vmatprep.subr.bf16.mxu1 %v6238_v47  ;;  %4349 = vmatpush1.bf16.msra.mxu0 %v6308_v36  ;;  %v6301_v47 = vld [vmem:[#allocation7 + $0x48c] ss:$16 sps:$4 sm:$0xff]   ;;  %v6299_v36 = vld [vmem:[#allocation7 + $0x488] ss:$16 sps:$4 sm:$0xff]  }
 0x226   :  { %4350 = vmatprep.subr.bf16.mxu0 %v6316_v37  ;;  %v6307_v37 = vld [vmem:[#allocation7 + $0x46c] ss:$16 sps:$4 sm:$0xff]  }
 0x228   :  { %4386 = vmatpush1.bf16.msra.mxu1 %v6236_v38  ;;  %v6305_v38 = vld [vmem:[#allocation7 + $0x468] ss:$16 sps:$4 sm:$0xff]  }
 0x229   :  { %4387 = vmatprep.subr.bf16.mxu1 %v6241_v39  ;;  %4351 = vmatpush1.bf16.msra.mxu0 %v6314_v41  ;;  %v6313_v39 = vld [vmem:[#allocation7 + $0x44c] ss:$16 sps:$4 sm:$0xff]   ;;  %v6311_v41 = vld [vmem:[#allocation7 + $0x448] ss:$16 sps:$4 sm:$0xff]  }
 0x22a   :  { %4352 = vmatprep.subr.bf16.mxu0 %v6322_v42  ;;  %v6317_v42 = vld [vmem:[#allocation7 + $0x428] ss:$16 sps:$4 sm:$0xff]  }
 0x22c   :  { %4388 = vmatpush1.bf16.msra.mxu1 %v6239_v43  ;;  %v6325_v43 = vld [vmem:[#allocation7 + $0x40c] ss:$16 sps:$4 sm:$0xff]  }
 0x22d   :  { %4389 = vmatprep.subr.bf16.mxu1 %v6244_v48  ;;  %4353 = vmatpush1.bf16.msra.mxu0 %v6320_v40  ;;  %v6323_v48 = vld [vmem:[#allocation7 + $0x408] ss:$16 sps:$4 sm:$0xff]   ;;  %v6331_v40 = vld [vmem:[#allocation7 + $0x5ec] ss:$16 sps:$4 sm:$0xff]  }
 0x22e   :  { %4354 = vmatprep.subr.bf16.mxu0 %v6328_v49  ;;  %v6329_v49 = vld [vmem:[#allocation7 + $0x5e8] ss:$16 sps:$4 sm:$0xff]  }
 0x230   :  { %4390 = vmatpush1.bf16.msra.mxu1 %v6242_v50  ;;  %v6337_v50 = vld [vmem:[#allocation7 + $0x5cc] ss:$16 sps:$4 sm:$0xff]  }
 0x231   :  { %4391 = vmatprep.subr.bf16.mxu1 %v6247_v45  ;;  %4355 = vmatpush2.bf16.msra.mxu0 %v6326_v46  ;;  %v6335_v45 = vld [vmem:[#allocation7 + $0x5c8] ss:$16 sps:$4 sm:$0xff]  }
 0x232   :  { %4356 = vmatprep.subr.bf16.mxu0 %v6334_v28 }
 0x234   :  { %4392 = vmatpush1.bf16.msra.mxu1 %v6245_v51  ;;  %v6343_v51 = vld [vmem:[#allocation7 + $0x5ac] ss:$16 sps:$4 sm:$0xff]  }
 0x235   :  { %4393 = vmatprep.subr.bf16.mxu1 %v6250_v52  ;;  %4357 = vmatpush2.bf16.msra.mxu0 %v6332_v55  ;;  %v6341_v52 = vld [vmem:[#allocation7 + $0x5a8] ss:$16 sps:$4 sm:$0xff]  }
 0x236   :  { %4358 = vmatprep.subr.bf16.mxu0 %v6340_v56 }
 0x238   :  { %4394 = vmatpush1.bf16.msra.mxu1 %v6248_v58  ;;  %v6349_v58 = vld [vmem:[#allocation7 + $0x58c] ss:$16 sps:$4 sm:$0xff]  }
 0x239   :  { %4395 = vmatprep.subr.bf16.mxu1 %v6253_v60  ;;  %4359 = vmatpush2.bf16.msra.mxu0 %v6338_v61  ;;  %v6347_v60 = vld [vmem:[#allocation7 + $0x588] ss:$16 sps:$4 sm:$0xff]  }
 0x23a   :  { %4360 = vmatprep.subr.bf16.mxu0 %v6346_v62 }
 0x23c   :  { %4396 = vmatpush1.bf16.msra.mxu1 %v6251_v63  ;;  %v6355_v63 = vld [vmem:[#allocation7 + $0x56c] ss:$16 sps:$4 sm:$0xff]  }
 0x23d   :  { %4397 = vmatprep.subr.bf16.mxu1 %v6256_v0  ;;  %4361 = vmatpush2.bf16.msra.mxu0 %v6344_v1  ;;  %v3036_v0 = vsub.s32 4, %v6744_v57  ;;  %v6353_v1 = vld [vmem:[#allocation7 + $0x568] ss:$16 sps:$4 sm:$0xff]  }
 0x23e   :  { %4362 = vmatprep.subr.bf16.mxu0 %v6352_v54 }
 0x240   :  { %4398 = vmatpush2.bf16.msra.mxu1 %v6254_v3 }
 0x241   :  { %4399 = vmatprep.subr.bf16.mxu1 %v6259_v4  ;;  %4363 = vmatpush2.bf16.msra.mxu0 %v6350_v5  ;;  %v6361_v4 = vld [vmem:[#allocation7 + $0x54c] ss:$16 sps:$4 sm:$0xff]  }
 0x242   :  { %4364 = vmatprep.subr.bf16.mxu0 %v6358_v7  ;;  %v3040_v7 = vsub.s32 5, %v6744_v57 }
 0x244   :  { %4400 = vmatpush2.bf16.msra.mxu1 %v6257_v8 }
 0x245   :  { %4401 = vmatprep.subr.bf16.mxu1 %v6262_v9  ;;  %4365 = vmatpush2.bf16.msra.mxu0 %v6356_v10 }
 0x246   :  { %4366 = vmatprep.subr.bf16.mxu0 %v6364_v11 }
 0x248   :  { %4402 = vmatpush2.bf16.msra.mxu1 %v6260_v14  ;;  %v6458_v14 = vld [vmem:[#allocation5] sm:$0x3f] }
 0x249   :  { %4403 = vmatprep.subr.bf16.mxu1 %v6265_v15  ;;  %4367 = vmatpush2.bf16.msra.mxu0 %v6362_v16  ;;  %v3037_v15 = vrot.slane %v6458_v14, %v3036_v0  ;;  %v6359_v16 = vld [vmem:[#allocation7 + $0x548] ss:$16 sps:$4 sm:$0xff]  }
 0x24a   :  { %4368 = vmatprep.subr.bf16.mxu0 %v6370_v17  ;;  %v6401_v0 = vld [vmem:[#allocation7 + $0x3c8] ss:$16 sps:$4 sm:$0xff]  }
 0x24c   :  { %4404 = vmatpush2.bf16.msra.mxu1 %v6263_v18 }
 0x24d   :  { %4405 = vmatprep.subr.bf16.mxu1 %v6268_v19  ;;  %4369 = vmatpush2.bf16.msra.mxu0 %v6368_v20  ;;  %v6367_v19 = vld [vmem:[#allocation7 + $0x52c] ss:$16 sps:$4 sm:$0xff]  }
 0x24e   :  { %4424 = vmatprep.subr.bf16.mxu0 %v6376_v12 }
 0x24f   :  { %v2839_v46 = vpop.f32.mrf.mxu0 }
 0x250   :  { %4406 = vmatpush2.bf16.msra.mxu1 %v6266_v21  ;;  %v2882_v28 = vpop.f32.mrf.mxu1 }
 0x251   :  { %4407 = vmatprep.subr.bf16.mxu1 %v6271_v13  ;;  %v2841_v55 = vpop.f32.mrf.mxu0  ;;  %v2883_v5 = vadd.f32 %v2882_v28, %v2839_v46  ;;  %v3041_v13 = vrot.slane %v6458_v14, %v3040_v7  ;;  %v6383_v46 = vld [vmem:[#allocation7 + $0x288] ss:$16 sps:$4 sm:$0xff]   ;;  %v6388_v28 = vld [vmem:[#allocation7 + $0x26c] ss:$16 sps:$4 sm:$0xff]  }
 0x252   :  { %v2884_v56 = vpop.f32.mrf.mxu1  ;;  %v6410_v7 = vld [vmem:[#allocation7 + $0x368] ss:$16 sps:$4 sm:$0xff]   ;;  %v6421_v14 = vld [vmem:[#allocation7 + $0x30c] ss:$16 sps:$4 sm:$0xff]  }
 0x253   :  { %v2843_v61 = vpop.f32.mrf.mxu0  ;;  %v2885_v10 = vadd.f32 %v2884_v56, %v2841_v55  ;;  %v6389_v55 = vld [vmem:[#allocation7 + $0x248] ss:$16 sps:$4 sm:$0xff]   ;;  %v6394_v56 = vld [vmem:[#allocation7 + $0x22c] ss:$16 sps:$4 sm:$0xff]  }
 0x254   :  { %4408 = vmatpush2.bf16.msra.mxu1 %v6269_v22  ;;  %v2886_v62 = vpop.f32.mrf.mxu1 }
 0x255   :  { %4409 = vmatprep.subr.bf16.mxu1 %v6274_v53  ;;  %v2845_v54 = vpop.f32.mrf.mxu0  ;;  %v2887_v20 = vadd.f32 %v2886_v62, %v2843_v61  ;;  %v6400_v61 = vld [vmem:[#allocation7 + $0x3ec] ss:$16 sps:$4 sm:$0xff]   ;;  %v6398_v62 = vld [vmem:[#allocation7 + $0x3e8] ss:$16 sps:$4 sm:$0xff]  }
 0x256   :  { %v2888_v3 = vpop.f32.mrf.mxu1 }
 0x258   :  { %4410 = vmatpush2.bf16.msra.mxu1 %v6272_v23  ;;  %v2889_v23 = vadd.f32 %v2888_v3, %v2845_v54  ;;  %v6404_v54 = vld [vmem:[#allocation7 + $0x3a8] ss:$16 sps:$4 sm:$0xff]   ;;  %v6409_v3 = vld [vmem:[#allocation7 + $0x38c] ss:$16 sps:$4 sm:$0xff]  }
 0x259   :  { %4411 = vmatprep.subr.bf16.mxu1 %v6277_v24 }
 0x25c   :  { %4412 = vmatpush2.bf16.msra.mxu1 %v6275_v25 }
 0x25d   :  { %4467 = vmatprep.subr.bf16.mxu1 %v6283_v26 }
 0x25f   :  { %4414 = vmatmul.mubr.bf16.vlgmr.msra.gmra.mxu1 %v6772_v44  ;;  %v6319_v44 = vld [vmem:[#allocation7 + $0x42c] ss:$16 sps:$4 sm:$0xff]  }
 0x260   :  { %4468 = vmatpush1.bf16.msra.mxu1 %v6281_v30  ;;  %v6365_v30 = vld [vmem:[#allocation7 + $0x528] ss:$16 sps:$4 sm:$0xff]  }
 0x261   :  { %4469 = vmatprep.subr.bf16.mxu1 %v6289_v32 }
 0x264   :  { %4470 = vmatpush1.bf16.msra.mxu1 %v6287_v33  ;;  %v6373_v33 = vld [vmem:[#allocation7 + $0x50c] ss:$16 sps:$4 sm:$0xff]  }
 0x265   :  { %4471 = vmatprep.subr.bf16.mxu1 %v6295_v34 }
 0x268   :  { %4472 = vmatpush1.bf16.msra.mxu1 %v6293_v35 }
 0x269   :  { %4473 = vmatprep.subr.bf16.mxu1 %v6301_v47 }
 0x26c   :  { %4474 = vmatpush1.bf16.msra.mxu1 %v6299_v36 }
 0x26d   :  { %4475 = vmatprep.subr.bf16.mxu1 %v6307_v37 }
 0x270   :  { %4476 = vmatpush1.bf16.msra.mxu1 %v6305_v38 }
 0x271   :  { %4477 = vmatprep.subr.bf16.mxu1 %v6313_v39  ;;  %v6371_v39 = vld [vmem:[#allocation7 + $0x508] ss:$16 sps:$4 sm:$0xff]  }
 0x274   :  { %4478 = vmatpush1.bf16.msra.mxu1 %v6311_v41 }
 0x275   :  { %4479 = vmatprep.subr.bf16.mxu1 %v6319_v44 }
 0x278   :  { %4480 = vmatpush1.bf16.msra.mxu1 %v6317_v42  ;;  %v6374_v42 = vld [vmem:[#allocation7 + $0x2e8] ss:$16 sps:$4 sm:$0xff]  }
 0x279   :  { %4481 = vmatprep.subr.bf16.mxu1 %v6325_v43 }
 0x27c   :  { %4482 = vmatpush1.bf16.msra.mxu1 %v6323_v48  ;;  %v6379_v48 = vld [vmem:[#allocation7 + $0x2cc] ss:$16 sps:$4 sm:$0xff]  }
 0x27d   :  { %4483 = vmatprep.subr.bf16.mxu1 %v6331_v40  ;;  %v6377_v40 = vld [vmem:[#allocation7 + $0x2c8] ss:$16 sps:$4 sm:$0xff]  }
 0x280   :  { %4484 = vmatpush2.bf16.msra.mxu1 %v6329_v49  ;;  %v6382_v49 = vld [vmem:[#allocation7 + $0x2ac] ss:$16 sps:$4 sm:$0xff]  }
 0x281   :  { %4485 = vmatprep.subr.bf16.mxu1 %v6337_v50  ;;  %v6380_v50 = vld [vmem:[#allocation7 + $0x2a8] ss:$16 sps:$4 sm:$0xff]  }
 0x284   :  { %4486 = vmatpush2.bf16.msra.mxu1 %v6335_v45  ;;  %v6385_v45 = vld [vmem:[#allocation7 + $0x28c] ss:$16 sps:$4 sm:$0xff]  }
 0x285   :  { %4487 = vmatprep.subr.bf16.mxu1 %v6343_v51  ;;  %v6386_v51 = vld [vmem:[#allocation7 + $0x268] ss:$16 sps:$4 sm:$0xff]  }
 0x288   :  { %4488 = vmatpush2.bf16.msra.mxu1 %v6341_v52  ;;  %v6391_v52 = vld [vmem:[#allocation7 + $0x24c] ss:$16 sps:$4 sm:$0xff]  }
 0x289   :  { %4489 = vmatprep.subr.bf16.mxu1 %v6349_v58  ;;  %v6397_v58 = vld [vmem:[#allocation7 + $0x20c] ss:$16 sps:$4 sm:$0xff]  }
 0x28c   :  { %4490 = vmatpush2.bf16.msra.mxu1 %v6347_v60  ;;  %v6395_v60 = vld [vmem:[#allocation7 + $0x208] ss:$16 sps:$4 sm:$0xff]  }
 0x28d   :  { %4491 = vmatprep.subr.bf16.mxu1 %v6355_v63  ;;  %v6403_v63 = vld [vmem:[#allocation7 + $0x3cc] ss:$16 sps:$4 sm:$0xff]  }
 0x28f   :  { %v2925_v8 = vpop.f32.mrf.mxu0 }
 0x290   :  { %v2968_v9 = vpop.f32.mrf.mxu1  ;;  %v2926_v11 = vadd.f32 %v2925_v8, %v2883_v5  ;;  %4492 = vmatpush2.bf16.msra.mxu1 %v6353_v1  ;;  %v6406_v1 = vld [vmem:[#allocation7 + $0x3ac] ss:$16 sps:$4 sm:$0xff]  }
 0x291   :  { %v2927_v17 = vpop.f32.mrf.mxu0  ;;  %4493 = vmatprep.subr.bf16.mxu1 %v6361_v4  ;;  %v6407_v4 = vld [vmem:[#allocation7 + $0x388] ss:$16 sps:$4 sm:$0xff]   ;;  %v6412_v5 = vld [vmem:[#allocation7 + $0x36c] ss:$16 sps:$4 sm:$0xff]  }
 0x292   :  { %v2970_v18 = vpop.f32.mrf.mxu1  ;;  %v2969_v12 = vadd.f32 %v2968_v9, %v2926_v11  ;;  %v2928_v21 = vadd.f32 %v2927_v17, %v2885_v10  ;;  %v6415_v8 = vld [vmem:[#allocation7 + $0x34c] ss:$16 sps:$4 sm:$0xff]   ;;  %v6413_v9 = vld [vmem:[#allocation7 + $0x348] ss:$16 sps:$4 sm:$0xff]  }
 0x293   :  { %v2929_v22 = vpop.f32.mrf.mxu0  ;;  %v6418_v10 = vld [vmem:[#allocation7 + $0x32c] ss:$16 sps:$4 sm:$0xff]   ;;  %v6416_v11 = vld [vmem:[#allocation7 + $0x328] ss:$16 sps:$4 sm:$0xff]  }
 0x294   :  { %v2972_v53 = vpop.f32.mrf.mxu1  ;;  %v3052_v24 = vadd.f32 %v3037_v15, %v2969_v12  ;;  %v2971_v25 = vadd.f32 %v2970_v18, %v2928_v21  ;;  %v2930_v26 = vadd.f32 %v2929_v22, %v2887_v20  ;;  %4494 = vmatpush2.bf16.msra.mxu1 %v6359_v16  ;;  %v6422_v16 = vld [vmem:[#allocation10 + $0x78] sm:$0xff]   ;;  %v6424_v18 = vld [vmem:[#allocation10 + $0x70] sm:$0xff]   ;;  %v6426_v20 = vld [vmem:[#allocation10 + $0x68] sm:$0xff]  }
 0x295   :  { %v2931_v32 = vpop.f32.mrf.mxu0  ;;  %4495 = vmatprep.subr.bf16.mxu1 %v6367_v19  ;;  %v6423_v17 = vld [vmem:[#allocation10 + $0x38] sm:$0xff]   ;;  %v6425_v19 = vld [vmem:[#allocation10 + $0x30] sm:$0xff]   ;;  %v6427_v12 = vld [vmem:[#allocation10 + $0x28] sm:$0xff]  }
 0x296   :  { %3064 = vst [vmem:[%s6853_s7 + $0x20] sm:$0xff] %v3052_v24  ;;  %v3053_v34 = vadd.f32 %v3041_v13, %v2971_v25  ;;  %v2973_v35 = vadd.f32 %v2972_v53, %v2930_v26  ;;  %v2932_v47 = vadd.f32 %v2931_v32, %v2889_v23  ;;  %v2974_v36 = vpop.f32.mrf.mxu1  ;;  %v6428_v21 = vld [vmem:[#allocation10 + $0x60] sm:$0xff]   ;;  %v6430_v22 = vld [vmem:[#allocation10 + $0x58] sm:$0xff]   ;;  %v6432_v23 = vld [vmem:[#allocation10 + $0x50] sm:$0xff]  }
 0x297   :  { %v6431_v53 = vld [vmem:[#allocation10 + $0x18] sm:$0xff]   ;;  %v6440_v26 = vld [vmem:[#allocation10 + $0xf0] sm:$0xff]   ;;  %v6434_v32 = vld [vmem:[#allocation10 + $0x48] sm:$0xff]  }
 0x298   :  { %3065 = vst [vmem:[%s6853_s7 + $0x28] sm:$0xff] %v3053_v34  ;;  %v3058_v37 = vadd.f32 %v3037_v15, %v2973_v35  ;;  %v2975_v38 = vadd.f32 %v2974_v36, %v2932_v47  ;;  %4496 = vmatpush2.bf16.msra.mxu1 %v6365_v30  ;;  %v6419_v15 = vld [vmem:[#allocation7 + $0x308] ss:$16 sps:$4 sm:$0xff]   ;;  %v6439_v25 = vld [vmem:[#allocation10 + $0xb8] sm:$0xff]   ;;  %v6443_v35 = vld [vmem:[#allocation10 + $0xa8] sm:$0xff]  }
 0x299   :  { %4497 = vmatprep.subr.bf16.mxu1 %v6373_v33  ;;  %v6441_v30 = vld [vmem:[#allocation10 + $0xb0] sm:$0xff]   ;;  %v6442_v33 = vld [vmem:[#allocation10 + $0xe8] sm:$0xff]   ;;  %v6436_v47 = vld [vmem:[#allocation10 + $0x40] sm:$0xff]  }
 0x29a   :  { %3070 = vst [vmem:[%s6853_s7 + $0x50] sm:$0xff] %v3058_v37  ;;  %v3059_v41 = vadd.f32 %v3041_v13, %v2975_v38  ;;  %v3076_v43 = vpack.c.bf16 %v3058_v37, %v3052_v24  ;;  %v6429_v13 = vld [vmem:[#allocation10 + $0x20] sm:$0xff]   ;;  %v6438_v24 = vld [vmem:[#allocation10 + $0xf8] sm:$0xff]  }
 0x29b   :  { %v6444_v36 = vld [vmem:[#allocation10 + $0xe0] sm:$0xff]  }
 0x29c   :  { %3071 = vst [vmem:[%s6853_s7 + $0x58] sm:$0xff] %v3059_v41  ;;  %4498 = vmatpush2.bf16.msra.mxu1 %v6371_v39  ;;  %v3077_v44 = vpack.c.bf16 %v3059_v41, %v3053_v34  ;;  %v6435_v34 = vld [vmem:[#allocation10 + $0x8] sm:$0xff]   ;;  %v6437_v37 = vld [vmem:[#allocation10] sm:$0xff]   ;;  %v6446_v39 = vld [vmem:[#allocation10 + $0xd8] sm:$0xff]  }
 0x29d   :  { %5524 = vmatprep.subr.bf16.mxu1 %v6438_v24  ;;  %v6445_v38 = vld [vmem:[#allocation10 + $0xa0] sm:$0xff]   ;;  %v6447_v41 = vld [vmem:[#allocation10 + $0x98] sm:$0xff]  }
 0x29e   :  { %4370 = vmatprep.mubr.bf16.mxu0 %v3077_v44  ;;  %4499 = vmatprep.mubr.bf16.mxu1 %v3077_v44  ;;  %v6448_v44 = vld [vmem:[#allocation10 + $0xd0] sm:$0xff]  }
 0x29f   :  { %4371 = vmatmul.mubr.bf16.vlgmr.msra.gmra.mxu0 %v3076_v43  ;;  %4500 = vmatmul.mubr.bf16.vlgmr.msra.gmra.mxu1 %v3076_v43  ;;  %v6450_v43 = vld [vmem:[#allocation10 + $0xc8] sm:$0xff]  }
 0x2a0   :  { %4425 = vmatpush1.bf16.msra.mxu0 %v6374_v42  ;;  %4456 = vmatprep.mubr.bf16.mxu0 %v6808_v27  ;;  %v6392_v27 = vld [vmem:[#allocation7 + $0x228] ss:$16 sps:$4 sm:$0xff]  }
 0x2a1   :  { %4426 = vmatprep.subr.bf16.mxu0 %v6379_v48  ;;  %5525 = vmatpush3.bf16.msra.mxu1 %v6439_v25  ;;  %v6449_v42 = vld [vmem:[#allocation10 + $0x90] sm:$0xff]   ;;  %v6451_v48 = vld [vmem:[#allocation10 + $0x88] sm:$0xff]  }
 0x2a2   :  { %5526 = vmatprep.subr.bf16.mxu1 %v6440_v26 }
 0x2a4   :  { %4427 = vmatpush1.bf16.msra.mxu0 %v6377_v40  ;;  %v6452_v40 = vld [vmem:[#allocation10 + $0xc0] sm:$0xff]  }
 0x2a5   :  { %4428 = vmatprep.subr.bf16.mxu0 %v6382_v49  ;;  %5527 = vmatpush3.bf16.msra.mxu1 %v6441_v30  ;;  %v6453_v49 = vld [vmem:[#allocation10 + $0x80] sm:$0xff]  }
 0x2a6   :  { %5528 = vmatprep.subr.bf16.mxu1 %v6442_v33 }
 0x2a8   :  { %4429 = vmatpush1.bf16.msra.mxu0 %v6380_v50 }
 0x2a9   :  { %4430 = vmatprep.subr.bf16.mxu0 %v6385_v45  ;;  %5529 = vmatpush3.bf16.msra.mxu1 %v6443_v35 }
 0x2aa   :  { %5530 = vmatprep.subr.bf16.mxu1 %v6444_v36 }
 0x2ac   :  { %4431 = vmatpush1.bf16.msra.mxu0 %v6383_v46 }
 0x2ad   :  { %4432 = vmatprep.subr.bf16.mxu0 %v6388_v28  ;;  %5531 = vmatpush3.bf16.msra.mxu1 %v6445_v38 }
 0x2ae   :  { %5532 = vmatprep.subr.bf16.mxu1 %v6446_v39 }
 0x2b0   :  { %4433 = vmatpush1.bf16.msra.mxu0 %v6386_v51 }
 0x2b1   :  { %4434 = vmatprep.subr.bf16.mxu0 %v6391_v52  ;;  %5533 = vmatpush3.bf16.msra.mxu1 %v6447_v41  ;;  %v3270_v52 = vld [vmem:[#allocation8] sm:$0xf] }
 0x2b2   :  { %5534 = vmatprep.subr.bf16.mxu1 %v6448_v44 }
 0x2b4   :  { %4435 = vmatpush1.bf16.msra.mxu0 %v6389_v55  ;;  %v3279_v55 = vrot.slane %v3270_v52, %v3024_v6 }
 0x2b5   :  { %4436 = vmatprep.subr.bf16.mxu0 %v6394_v56  ;;  %5535 = vmatpush3.bf16.msra.mxu1 %v6449_v42  ;;  %v3275_v56 = vrot.slane %v3270_v52, %v3020_v2 }
 0x2b6   :  { %5536 = vmatprep.subr.bf16.mxu1 %v6450_v43 }
 0x2b8   :  { %4437 = vmatpush1.bf16.msra.mxu0 %v6392_v27 }
 0x2b9   :  { %4438 = vmatprep.subr.bf16.mxu0 %v6397_v58  ;;  %5537 = vmatpush3.bf16.msra.mxu1 %v6451_v48 }
 0x2ba   :  { %5538 = vmatprep.subr.bf16.mxu1 %v6452_v40 }
 0x2bc   :  { %4439 = vmatpush1.bf16.msra.mxu0 %v6395_v60 }
 0x2bd   :  { %4440 = vmatprep.subr.bf16.mxu0 %v6400_v61  ;;  %5539 = vmatpush3.bf16.msra.mxu1 %v6453_v49 }
 0x2c0   :  { %4441 = vmatpush2.bf16.msra.mxu0 %v6398_v62 }
 0x2c1   :  { %4442 = vmatprep.subr.bf16.mxu0 %v6403_v63 }
 0x2c4   :  { %4443 = vmatpush2.bf16.msra.mxu0 %v6401_v0 }
 0x2c5   :  { %4444 = vmatprep.subr.bf16.mxu0 %v6406_v1 }
 0x2c8   :  { %4445 = vmatpush2.bf16.msra.mxu0 %v6404_v54 }
 0x2c9   :  { %4446 = vmatprep.subr.bf16.mxu0 %v6409_v3 }
 0x2cc   :  { %4447 = vmatpush2.bf16.msra.mxu0 %v6407_v4 }
 0x2cd   :  { %4448 = vmatprep.subr.bf16.mxu0 %v6412_v5 }
 0x2cf   :  { %v4286_v50 = vpop.f32.mrf.mxu0 }
 0x2d0   :  { %4449 = vmatpush2.bf16.msra.mxu0 %v6410_v7  ;;  %v4287_v63 = vadd.f32 %v4286_v50, %v3275_v56 }
 0x2d1   :  { %4450 = vmatprep.subr.bf16.mxu0 %v6415_v8  ;;  %v4288_v45 = vpop.f32.mrf.mxu0 }
 0x2d2   :  { %v4289_v61 = vadd.f32 %v4288_v45, %v3279_v55 }
 0x2d3   :  { %v4290_v28 = vpop.f32.mrf.mxu0 }
 0x2d4   :  { %4451 = vmatpush2.bf16.msra.mxu0 %v6413_v9  ;;  %v4291_v62 = vadd.f32 %v4290_v28, %v3275_v56 }
 0x2d5   :  { %4452 = vmatprep.subr.bf16.mxu0 %v6418_v10  ;;  %v4292_v27 = vpop.f32.mrf.mxu0 }
 0x2d6   :  { %v4293_v54 = vadd.f32 %v4292_v27, %v3279_v55 }
 0x2d8   :  { %4453 = vmatpush2.bf16.msra.mxu0 %v6416_v11 }
 0x2d9   :  { %4454 = vmatprep.subr.bf16.mxu0 %v6421_v14 }
 0x2dc   :  { %4455 = vmatpush2.bf16.msra.mxu0 %v6419_v15 }
 0x2dd   :  { %5502 = vmatprep.subr.bf16.mxu0 %v6422_v16 }
 0x2df   :  { %4457 = vmatmul.mubr.bf16.vlgmr.msra.gmra.mxu0 %v6810_v31  ;;  %v6433_v31 = vld [vmem:[#allocation10 + $0x10] sm:$0xff]   ;;  %v4329_v46 = vpop.f32.mrf.mxu1 }
 0x2e0   :  { %5503 = vmatpush3.bf16.msra.mxu0 %v6423_v17  ;;  %v4330_v5 = vadd.f32 %v4329_v46, %v4287_v63 }
 0x2e1   :  { %5504 = vmatprep.subr.bf16.mxu0 %v6424_v18  ;;  %v4331_v51 = vpop.f32.mrf.mxu1 }
 0x2e2   :  { %v4332_v3 = vadd.f32 %v4331_v51, %v4289_v61 }
 0x2e3   :  { %v4333_v58 = vpop.f32.mrf.mxu1 }
 0x2e4   :  { %5505 = vmatpush3.bf16.msra.mxu0 %v6425_v19  ;;  %v4334_v4 = vadd.f32 %v4333_v58, %v4291_v62 }
 0x2e5   :  { %5506 = vmatprep.subr.bf16.mxu0 %v6426_v20  ;;  %v4335_v0 = vpop.f32.mrf.mxu1 }
 0x2e6   :  { %v4336_v8 = vadd.f32 %v4335_v0, %v4293_v54 }
 0x2e8   :  { %5507 = vmatpush3.bf16.msra.mxu0 %v6427_v12 }
 0x2e9   :  { %5508 = vmatprep.subr.bf16.mxu0 %v6428_v21 }
 0x2ec   :  { %5509 = vmatpush3.bf16.msra.mxu0 %v6429_v13 }
 0x2ed   :  { %5510 = vmatprep.subr.bf16.mxu0 %v6430_v22 }
 0x2f0   :  { %5511 = vmatpush3.bf16.msra.mxu0 %v6431_v53  ;;  %v3287_v53 = vrot.slane %v3270_v52, %v3032_v59 }
 0x2f1   :  { %5512 = vmatprep.subr.bf16.mxu0 %v6432_v23  ;;  %v3283_v23 = vrot.slane %v3270_v52, %v3028_v29  ;;  %v5469_v52 = vld [vmem:[#allocation11] ss:$0 sm:$0xff] }
 0x2f4   :  { %5513 = vmatpush3.bf16.msra.mxu0 %v6433_v31 }
 0x2f5   :  { %5514 = vmatprep.subr.bf16.mxu0 %v6434_v32 }
 0x2f8   :  { %5515 = vmatpush3.bf16.msra.mxu0 %v6435_v34 }
 0x2f9   :  { %5516 = vmatprep.subr.bf16.mxu0 %v6436_v47 }
 0x2fc   :  { %5517 = vmatpush3.bf16.msra.mxu0 %v6437_v37 }
 0x31f   :  { %v4415_v20 = vpop.f32.mrf.mxu1 }
 0x320   :  { %v4416_v31 = vadd.f32 %v4415_v20, %v3283_v23 }
 0x321   :  { %v4417_v12 = vpop.f32.mrf.mxu1 }
 0x322   :  { %v4418_v26 = vadd.f32 %v4417_v12, %v3287_v53 }
 0x323   :  { %v4419_v21 = vpop.f32.mrf.mxu1 }
 0x324   :  { %v4420_v32 = vadd.f32 %v4419_v21, %v3283_v23 }
 0x325   :  { %v4421_v13 = vpop.f32.mrf.mxu1 }
 0x326   :  { %v4422_v36 = vadd.f32 %v4421_v13, %v3287_v53 }
 0x35f   :  { %v4372_v60 = vpop.f32.mrf.mxu0  ;;  %v4501_v22 = vpop.f32.mrf.mxu1 }
 0x360   :  { %v4373_v6 = vadd.f32 %v4372_v60, %v4330_v5 }
 0x361   :  { %v4374_v1 = vpop.f32.mrf.mxu0  ;;  %v4503_v24 = vpop.f32.mrf.mxu1 }
 0x362   :  { %v4375_v9 = vadd.f32 %v4374_v1, %v4332_v3  ;;  %v4510_v17 = vmax.f32 %v4373_v6, 0.0 }
 0x363   :  { %v4376_v7 = vpop.f32.mrf.mxu0  ;;  %v4505_v34 = vpop.f32.mrf.mxu1 }
 0x364   :  { %v4377_v10 = vadd.f32 %v4376_v7, %v4334_v4  ;;  %v4511_v15 = vmax.f32 %v4375_v9, 0.0 }
 0x365   :  { %v4378_v11 = vpop.f32.mrf.mxu0  ;;  %v4507_v59 = vpop.f32.mrf.mxu1 }
 0x366   :  { %v4379_v14 = vadd.f32 %v4378_v11, %v4336_v8  ;;  %v4514_v2 = vmax.f32 %v4377_v10, 0.0 }
 0x368   :  { %v4515_v16 = vmax.f32 %v4379_v14, 0.0  ;;  %v4518_v19 = vpack.c.bf16 %v4514_v2, %v4510_v17 }
 0x36a   :  { %v4519_v18 = vpack.c.bf16 %v4515_v16, %v4511_v15 }
 0x36c   :  { %4817 = vmatprep.mubr.bf16.mxu0 %v4519_v18 }
 0x36d   :  { %4818 = vmatmul.mubr.bf16.vlgmr.msra.gmra.mxu0 %v4518_v19 }
 0x39f   :  { %v4458_v25 = vpop.f32.mrf.mxu0 }
 0x3a0   :  { %v4459_v35 = vadd.f32 %v4458_v25, %v4416_v31 }
 0x3a1   :  { %v4460_v30 = vpop.f32.mrf.mxu0 }
 0x3a2   :  { %v4461_v33 = vadd.f32 %v4460_v30, %v4418_v26  ;;  %v4502_v42 = vadd.f32 %v4501_v22, %v4459_v35 }
 0x3a3   :  { %v4462_v47 = vpop.f32.mrf.mxu0 }
 0x3a4   :  { %v4463_v37 = vadd.f32 %v4462_v47, %v4420_v32  ;;  %v4504_v39 = vadd.f32 %v4503_v24, %v4461_v33  ;;  %v4512_v40 = vmax.f32 %v4502_v42, 0.0 }
 0x3a5   :  { %v4464_v38 = vpop.f32.mrf.mxu0 }
 0x3a6   :  { %v4506_v41 = vadd.f32 %v4505_v34, %v4463_v37  ;;  %v4465_v44 = vadd.f32 %v4464_v38, %v4422_v36  ;;  %v4513_v43 = vmax.f32 %v4504_v39, 0.0 }
 0x3a8   :  { %v4508_v57 = vadd.f32 %v4507_v59, %v4465_v44  ;;  %v4516_v29 = vmax.f32 %v4506_v41, 0.0 }
 0x3aa   :  { %v4517_v48 = vmax.f32 %v4508_v57, 0.0  ;;  %v4520_v50 = vpack.c.bf16 %v4516_v29, %v4512_v40 }
 0x3ac   :  { %v4521_v49 = vpack.c.bf16 %v4517_v48, %v4513_v43 }
 0x3ae   :  { %4858 = vmatprep.mubr.bf16.mxu1 %v4521_v49 }
 0x3af   :  { %4859 = vmatmul.mubr.bf16.vlgmr.msra.gmra.mxu1 %v4520_v50 }
 0x42d   :  { %v5518_v45 = vpop.f32.mrf.mxu0 }
 0x42f   :  { %v5519_v46 = vpop.f32.mrf.mxu0 }
 0x430   :  { %v5520_v51 = vadd.f32 %v5519_v46, %v5518_v45 }
 0x431   :  { %v5521_v28 = vpop.f32.mrf.mxu0 }
 0x432   :  { %v4820_v58 = vadd.f32 %v5520_v51, %v5469_v52 }
 0x433   :  { %v5522_v55 = vpop.f32.mrf.mxu0 }
 0x434   :  { %v5523_v60 = vadd.f32 %v5522_v55, %v5521_v28 }
 0x436   :  { %v4823_v1 = vadd.f32 %v5523_v60, %v5469_v52 }
 0x46f   :  { %v5540_v56 = vpop.f32.mrf.mxu1 }
 0x471   :  { %v5541_v27 = vpop.f32.mrf.mxu1 }
 0x472   :  { %v5542_v61 = vadd.f32 %v5541_v27, %v5540_v56 }
 0x473   :  { %v5543_v62 = vpop.f32.mrf.mxu1 }
 0x474   :  { %v4861_v63 = vadd.f32 %v5542_v61, %v4820_v58 }
 0x475   :  { %v5544_v0 = vpop.f32.mrf.mxu1 }
 0x476   :  { %v5545_v54 = vadd.f32 %v5544_v0, %v5543_v62  ;;  %v4867_v3 = vmul.f32 %v4861_v63, %v4861_v63 }
 0x478   :  { %v4864_v4 = vadd.f32 %v5545_v54, %v4823_v1  ;;  %4869 = vadd.xlane.f32.xlu0 %v4867_v3 }
 0x47a   :  { %v4868_v5 = vmul.f32 %v4864_v4, %v4864_v4 }
 0x47c   :  { %4871 = vadd.xlane.f32.xlu0 %v4868_v5 }
 0x501   :  { %v4870_v7 = vpop.xlane.xlu0 %4869 }
 0x502   :  { %v4873_v8 = vmax.f32 %v4870_v7, 1e-24 }
 0x504   :  { %6454 = vrsqrt.f32 %v4873_v8 }
 0x505   :  { %v4872_v9 = vpop.xlane.xlu0 %4871 }
 0x506   :  { %v4874_v10 = vmax.f32 %v4872_v9, 1e-24 }
 0x508   :  { %6456 = vrsqrt.f32 %v4874_v10 }
 0x511   :  { %v6455_v6 = vpop.eup %6454 }
 0x512   :  { %v4877_v11 = vmul.f32 %v6455_v6, %v4861_v63 }
 0x514   :  { %4879 = vst [vmem:[%s6854_s8] sm:$0xff] %v4877_v11 }
 0x515   :  { %v6457_v14 = vpop.eup %6456 }
 0x516   :  { %v4878_v2 = vmul.f32 %v6457_v14, %v4864_v4 }
 0x518   :  { %4880 = vst [vmem:[%s6854_s8 + $0x8] sm:$0xff] %v4878_v2 }
 0x519   :  { %4889 = vsyncpa [#allocation4], 1 }
 0x51a   :  { %4890 = vsyncpa [#allocation6], 1 }
 0x51b   :  { %4891 = vsyncpa [#allocation9], 1 }
 0x51c   :  { %4892 = vsyncpa [#allocation12], 1 }

</bundles_post_ra>
